<compile_context>
chip_gen: v7x
topology: tpu7x:2x2x1
jax: 0.10.0
libtpu: 0.0.40
codegen_flags: <defaults>
</compile_context>

<pallas_src>
import functools

import jax
import jax.numpy as jnp
from jax import lax
from jax.experimental import pallas as pl
from jax.experimental.pallas import tpu as pltpu

KSIZE = 3            # conv kernel size
COUT = 16            # conv output channels
HID1, HID2 = 120, 84
HIDP = 128           # hidden dims zero-padded to one lane tile
LANE = 128
EPS = 1e-5
SP = 128             # per-sample pooled-spatial positions, zero-padded to one lane tile


def _round_up(a, b):
    return (a + b - 1) // b * b


def _fused_kernel(p_ref, w1_ref, wpack_ref, bpack_ref, o_ref, *,
                  n_batch, n_spatial, k_pad, out_dim):
    """Entire VentralPathway0 forward on one grid step.

    p_ref    : (K_pad, 4*N*SP) bf16  pool-quadrant im2col patches, cols = q*(N*SP)+n*SP+s.
               Row K holds the folded conv-bias "ones" (1 on valid spatial cols, 0 on padding).
    w1_ref   : (COUT, SP, HIDP) bf16 Linear1 weight, w1[c,s,h] = W1[h, c*S+s], zero-padded.
    wpack_ref: (2*HIDP+COUT, LANE) bf16  rows [0:128)=w2 pad, [128:256)=w3 pad,
               [256:272)=0.25*conv weight (+0.25*bias in col K).
    bpack_ref: (8, LANE) f32  row0=b1, row1=b2, row2=b3 (zero padded).
    o_ref    : (N, out_dim) f32
    """
    N = n_batch
    S = n_spatial                      # valid pooled positions per sample (Hp*Wp)
    QW = N * SP                        # columns per pool quadrant

    # ---- unpack the consolidated parameter buffers (aligned, free slices) ---------------
    w2p = wpack_ref[0:HIDP, :]                              # (128, 128) bf16
    w3p = wpack_ref[HIDP:2 * HIDP, :]                       # (128, 128) bf16
    wc = wpack_ref[2 * HIDP:2 * HIDP + COUT, :][:, :k_pad]  # (COUT, K_pad) bf16
    b1 = bpack_ref[0:1, :]                                  # (1, 128) f32
    b2 = bpack_ref[1:2, :]
    b3 = bpack_ref[2:3, :]

    # ---- Conv(k3) + folded bias + folded 0.25 pool scale + ReLU: ONE MXU matmul ---------
    y = jnp.dot(wc, p_ref[...], preferred_element_type=jnp.float32)   # (COUT, 4*QW)
    y = jnp.maximum(y, 0.0)

    # ---- AvgPool2d(2): sum of the 4 pre-scaled quadrants (lane-tile-aligned slices) -----
    pooled = (y[:, 0 * QW:1 * QW] + y[:, 1 * QW:2 * QW] +
              y[:, 2 * QW:3 * QW] + y[:, 3 * QW:4 * QW])              # (COUT, QW)

    # ---- BatchNorm2d (training batch stats, affine=False) -------------------------------
    # Padded spatial columns are exactly 0 (bias row zeroed there), so plain sums give the
    # masked mean and E[x^2]-E[x]^2 the masked biased variance (no iota/mod/select needed).
    inv_cnt = 1.0 / float(N * S)
    mean = jnp.sum(pooled, axis=1, keepdims=True) * inv_cnt           # (COUT, 1)
    ex2 = jnp.sum(pooled * pooled, axis=1, keepdims=True) * inv_cnt
    var = ex2 - mean * mean
    feat = (pooled - mean) * lax.rsqrt(var + EPS)                     # (COUT, QW) f32

    # ---- torch.flatten + Linear1 folded into one channel-batched MXU contraction --------
    #   h1[n,h] = sum_{c,s} feat[c, n*SP+s] * w1[c, s, h]
    # (padded s >= S lanes of feat hit zero rows of w1; padded h >= HID1 cols stay 0)
    f3 = feat.reshape(COUT, N, SP).astype(jnp.bfloat16)               # lane-aligned split
    part = jnp.einsum('cns,csh->cnh', f3, w1_ref[...],
                      preferred_element_type=jnp.float32)             # (COUT, N, HIDP)
    h1 = jnp.maximum(jnp.sum(part, axis=0) + b1, 0.0)                 # (N, HIDP)

    # ---- training-mode BatchNorm1d over the batch axis (affine=False) -------------------
    def bn_rows(h):
        m = jnp.mean(h, axis=0, keepdims=True)
        c = h - m
        v = jnp.mean(c * c, axis=0, keepdims=True)                    # biased variance
        return c * lax.rsqrt(v + EPS)

    h1 = bn_rows(h1)
    h2 = jnp.maximum(
        jnp.dot(h1.astype(jnp.bfloat16), w2p,
                preferred_element_type=jnp.float32) + b2, 0.0)        # (N, HIDP)
    h2 = bn_rows(h2)
    out = jnp.dot(h2.astype(jnp.bfloat16), w3p,
                  preferred_element_type=jnp.float32) + b3            # (N, LANE)
    o_ref[...] = out[:, :out_dim]


def _build_patches(x_nchw):
    """(N, Cin, H, W) -> (K_pad, 4*N*SP) bf16 pool-quadrant im2col, aligned/zero-padded.

    column = q*(N*SP) + n*SP + s  with q = di*2+dj (2x2 pool offset), s = hp*Wp+wp (< S).
    row    = (kh*KSIZE + kw)*Cin + cin; row K is the conv-bias ones-row (valid cols only);
             rows are zero-padded up to K_pad (multiple of 8).
    """
    N, Cin, H, W = x_nchw.shape
    Ho, Wo = H - KSIZE + 1, W - KSIZE + 1
    Hp, Wp = Ho // 2, Wo // 2
    S = Hp * Wp
    assert S <= SP, "spatial tile exceeds one lane tile; bump SP"
    taps = []
    for kh in range(KSIZE):
        for kw in range(KSIZE):
            taps.append(x_nchw[:, :, kh:kh + Ho, kw:kw + Wo])
    t = jnp.stack(taps, axis=0)                           # (T, N, Cin, Ho, Wo)
    t = t[:, :, :, :2 * Hp, :2 * Wp]                      # floor-mode pooling region
    t = t.reshape(KSIZE * KSIZE, N, Cin, Hp, 2, Wp, 2)    # (..., hp, di, wp, dj)
    t = t.transpose(4, 6, 0, 2, 1, 3, 5)                  # (di, dj, T, Cin, N, hp, wp)
    K = KSIZE * KSIZE * Cin
    t = t.reshape(4, K, N, S)
    ones = jnp.ones((4, 1, N, S), t.dtype)                # folded conv-bias row (valid cols)
    t = jnp.concatenate([t, ones], axis=1)                # (4, K+1, N, S)
    K_pad = _round_up(K + 1, 8)
    t = jnp.pad(t, ((0, 0), (0, K_pad - (K + 1)), (0, 0), (0, 0)))   # K+1 -> K_pad
    t = jnp.pad(t, ((0, 0), (0, 0), (0, 0), (0, SP - S)))            # pad spatial S -> SP
    t = t.reshape(4, K_pad, N * SP).transpose(1, 0, 2).reshape(K_pad, 4 * N * SP)
    return t.astype(jnp.bfloat16), (Hp, Wp, K, K_pad)


def _prep_params(params, S, K):
    wc, bc, w1, b1, w2, b2, w3, b3 = params
    out_dim = w3.shape[0]
    assert out_dim <= LANE, "out_dim > 128 needs a wider output pack"
    assert K + 1 <= LANE, "conv K + bias row must fit one lane tile of the weight pack"
    # conv weight (COUT, Cin, kh, kw) -> (COUT, K); 0.25 pool scale folded in (exact, 2^-2);
    # folded bias column at index K; padded to LANE columns for the packed buffer.
    wcf = 0.25 * jnp.transpose(wc, (0, 2, 3, 1)).reshape(COUT, K)
    wcf = jnp.concatenate([wcf, 0.25 * bc.reshape(COUT, 1)], axis=1)   # (COUT, K+1)
    wcf = jnp.pad(wcf, ((0, 0), (0, LANE - (K + 1))))                  # (COUT, 128)
    # Linear1 (120, COUT*S) -> (COUT, SP, HIDP), zero rows/cols on the padded axes
    w1r = w1.reshape(HID1, COUT, S).transpose(1, 2, 0)                 # (COUT, S, 120)
    w1r = jnp.pad(w1r, ((0, 0), (0, SP - S), (0, HIDP - HID1)))
    w1p = w1r.astype(jnp.bfloat16)                                     # (COUT, SP, HIDP)
    # Linear2 / Linear3 / conv weight packed into ONE bf16 buffer (fewer DMAs)
    w2p = jnp.pad(jnp.transpose(w2), ((0, HIDP - HID1), (0, HIDP - HID2)))   # (128, 128)
    w3p = jnp.pad(jnp.transpose(w3), ((0, HIDP - HID2), (0, LANE - out_dim)))
    wpack = jnp.concatenate([w2p, w3p, wcf], axis=0).astype(jnp.bfloat16)    # (272, 128)
    # biases kept f32 in one tiny (8, 128) buffer
    bpack = jnp.zeros((8, LANE), jnp.float32)
    bpack = bpack.at[0, :HID1].set(b1).at[1, :HID2].set(b2).at[2, :out_dim].set(b3)
    return w1p, wpack, bpack, out_dim


def ventral_pathway0_forward(x_nchw, params):
    assert x_nchw.ndim == 4
    N = x_nchw.shape[0]
    patches, (Hp, Wp, K, K_pad) = _build_patches(x_nchw.astype(jnp.float32))
    S = Hp * Wp
    w1p, wpack, bpack, out_dim = _prep_params(params, S, K)

    kernel = functools.partial(_fused_kernel, n_batch=N, n_spatial=S,
                               k_pad=K_pad, out_dim=out_dim)

    def full(shape):
        return pl.BlockSpec(shape, lambda i, _s=len(shape): (0,) * _s)

    return pl.pallas_call(
        kernel,
        out_shape=jax.ShapeDtypeStruct((N, out_dim), jnp.float32),
        grid=(1,),
        in_specs=[
            full(patches.shape), full(w1p.shape), full(wpack.shape), full(bpack.shape),
        ],
        out_specs=full((N, out_dim)),
        compiler_params=pltpu.CompilerParams(
            dimension_semantics=("arbitrary",),
            vmem_limit_bytes=32 * 1024 * 1024),
    )(patches, w1p, wpack, bpack)


def init_params(key, in_ch, feat_size, out_dim):
    ks = jax.random.split(key, 8)
    wc = jax.random.normal(ks[0], (COUT, in_ch, KSIZE, KSIZE), jnp.float32) * 0.1
    bc = jax.random.normal(ks[1], (COUT,), jnp.float32) * 0.1
    w1 = jax.random.normal(ks[2], (HID1, feat_size), jnp.float32) * 0.05
    b1 = jax.random.normal(ks[3], (HID1,), jnp.float32) * 0.05
    w2 = jax.random.normal(ks[4], (HID2, HID1), jnp.float32) * 0.05
    b2 = jax.random.normal(ks[5], (HID2,), jnp.float32) * 0.05
    w3 = jax.random.normal(ks[6], (out_dim, HID2), jnp.float32) * 0.05
    b3 = jax.random.normal(ks[7], (out_dim,), jnp.float32) * 0.05
    return (wc, bc, w1, b1, w2, b2, w3, b3)


if __name__ == "__main__":
    key = jax.random.PRNGKey(0)
    kx, kp = jax.random.split(key)

    # input_dim = (ch, wid, hei) = (4, 16, 16), batch = 2, output_dim = 10
    N, Cin, H, W = 2, 4, 16, 16
    OUT_DIM = 10
    Hp = (H - KSIZE + 1) // 2
    Wp = (W - KSIZE + 1) // 2
    feat_size = COUT * Hp * Wp            # = module's _get_feat_extr_output_size

    x = jax.random.normal(kx, (N, Cin, H, W), jnp.float32)
    params = init_params(kp, Cin, feat_size, OUT_DIM)

    out = jax.jit(ventral_pathway0_forward)(x, params)
    out = jax.block_until_ready(out)

    assert out.shape == (N, OUT_DIM), out.shape
    assert bool(jnp.all(jnp.isfinite(out)))
    print("KERNEL_OK")
</pallas_src>

<mosaic_0001>
module attributes {stable_mosaic.version = 11 : i64} {
  func.func @_fused_kernel(%arg0: i32, %arg1: memref<40x1024xbf16, #tpu.memory_space<vmem>>, %arg2: memref<16x128x128xbf16, #tpu.memory_space<vmem>>, %arg3: memref<272x128xbf16, #tpu.memory_space<vmem>>, %arg4: memref<8x128xf32, #tpu.memory_space<vmem>>, %arg5: memref<2x10xf32, #tpu.memory_space<vmem>>) attributes {dimension_semantics = [#tpu.dimension_semantics<arbitrary>], iteration_bounds = array<i64: 1>, scalar_prefetch = 0 : i64, scratch_operands = 0 : i64, tpu.core_type = #tpu.core_type<tc>, window_params = [{pipeline_mode = #tpu.pipeline_mode<synchronous>, transform_indices = @transform_0, window_bounds = array<i64: 40, 1024>}, {pipeline_mode = #tpu.pipeline_mode<synchronous>, transform_indices = @transform_1, window_bounds = array<i64: 16, 128, 128>}, {pipeline_mode = #tpu.pipeline_mode<synchronous>, transform_indices = @transform_2, window_bounds = array<i64: 272, 128>}, {pipeline_mode = #tpu.pipeline_mode<synchronous>, transform_indices = @transform_3, window_bounds = array<i64: 8, 128>}, {pipeline_mode = #tpu.pipeline_mode<synchronous>, transform_indices = @transform_4, window_bounds = array<i64: 2, 10>}]} {
    %c0 = arith.constant 0 : index
    %c0_0 = arith.constant 0 : index
    %0 = vector.load %arg3[%c0, %c0_0] : memref<272x128xbf16, #tpu.memory_space<vmem>>, vector<128x128xbf16>
    %c128 = arith.constant 128 : index
    %c0_1 = arith.constant 0 : index
    %1 = vector.load %arg3[%c128, %c0_1] : memref<272x128xbf16, #tpu.memory_space<vmem>>, vector<128x128xbf16>
    %c256 = arith.constant 256 : index
    %c0_2 = arith.constant 0 : index
    %2 = vector.load %arg3[%c256, %c0_2] : memref<272x128xbf16, #tpu.memory_space<vmem>>, vector<16x128xbf16>
    %3 = vector.extract_strided_slice %2 {offsets = [0, 0], sizes = [16, 40], strides = [1, 1]} : vector<16x128xbf16> to vector<16x40xbf16>
    %c0_3 = arith.constant 0 : index
    %c0_4 = arith.constant 0 : index
    %4 = vector.load %arg4[%c0_3, %c0_4] : memref<8x128xf32, #tpu.memory_space<vmem>>, vector<1x128xf32>
    %c1 = arith.constant 1 : index
    %c0_5 = arith.constant 0 : index
    %5 = vector.load %arg4[%c1, %c0_5] : memref<8x128xf32, #tpu.memory_space<vmem>>, vector<1x128xf32>
    %c2 = arith.constant 2 : index
    %c0_6 = arith.constant 0 : index
    %6 = vector.load %arg4[%c2, %c0_6] : memref<8x128xf32, #tpu.memory_space<vmem>>, vector<1x128xf32>
    %c0_7 = arith.constant 0 : index
    %c0_8 = arith.constant 0 : index
    %7 = vector.load %arg1[%c0_7, %c0_8] : memref<40x1024xbf16, #tpu.memory_space<vmem>>, vector<40x1024xbf16>
    %cst = arith.constant dense<0.000000e+00> : vector<16x1024xf32>
    %8 = tpu.matmul %3, %7, %cst {dimension_numbers = #tpu.dot_dimension_numbers<[1], [0], [0], [1], [0, 0, 1, 1], [], []>} : vector<16x40xbf16>, vector<40x1024xbf16>, vector<16x1024xf32> -> vector<16x1024xf32>
    %cst_9 = arith.constant 0.000000e+00 : f32
    %9 = vector.broadcast %cst_9 : f32 to vector<16x1024xf32>
    %10 = arith.maximumf %8, %9 : vector<16x1024xf32>
    %11 = vector.extract_strided_slice %10 {offsets = [0, 0], sizes = [16, 256], strides = [1, 1]} : vector<16x1024xf32> to vector<16x256xf32>
    %12 = vector.extract_strided_slice %10 {offsets = [0, 256], sizes = [16, 256], strides = [1, 1]} : vector<16x1024xf32> to vector<16x256xf32>
    %13 = arith.addf %11, %12 : vector<16x256xf32>
    %14 = vector.extract_strided_slice %10 {offsets = [0, 512], sizes = [16, 256], strides = [1, 1]} : vector<16x1024xf32> to vector<16x256xf32>
    %15 = arith.addf %13, %14 : vector<16x256xf32>
    %16 = vector.extract_strided_slice %10 {offsets = [0, 768], sizes = [16, 256], strides = [1, 1]} : vector<16x1024xf32> to vector<16x256xf32>
    %17 = arith.addf %15, %16 : vector<16x256xf32>
    %cst_10 = arith.constant dense<0.000000e+00> : vector<16xf32>
    %18 = vector.multi_reduction <add>, %17, %cst_10 [1] : vector<16x256xf32> to vector<16xf32>
    %19 = vector.shape_cast %18 : vector<16xf32> to vector<16x1xf32>
    %cst_11 = arith.constant 0.0102040814 : f32
    %20 = vector.broadcast %cst_11 : f32 to vector<16x1xf32>
    %21 = arith.mulf %19, %20 : vector<16x1xf32>
    %22 = arith.mulf %17, %17 : vector<16x256xf32>
    %cst_12 = arith.constant dense<0.000000e+00> : vector<16xf32>
    %23 = vector.multi_reduction <add>, %22, %cst_12 [1] : vector<16x256xf32> to vector<16xf32>
    %24 = vector.shape_cast %23 : vector<16xf32> to vector<16x1xf32>
    %cst_13 = arith.constant 0.0102040814 : f32
    %25 = vector.broadcast %cst_13 : f32 to vector<16x1xf32>
    %26 = arith.mulf %24, %25 : vector<16x1xf32>
    %27 = arith.mulf %21, %21 : vector<16x1xf32>
    %28 = arith.subf %26, %27 : vector<16x1xf32>
    %29 = vector.broadcast %21 : vector<16x1xf32> to vector<16x256xf32>
    %30 = arith.subf %17, %29 : vector<16x256xf32>
    %cst_14 = arith.constant 9.99999974E-6 : f32
    %31 = vector.broadcast %cst_14 : f32 to vector<16x1xf32>
    %32 = arith.addf %28, %31 : vector<16x1xf32>
    %33 = math.rsqrt %32 : vector<16x1xf32>
    %34 = vector.broadcast %33 : vector<16x1xf32> to vector<16x256xf32>
    %35 = arith.mulf %30, %34 : vector<16x256xf32>
    %36 = vector.shape_cast %35 : vector<16x256xf32> to vector<16x2x128xf32>
    %37 = arith.truncf %36 : vector<16x2x128xf32> to vector<16x2x128xbf16>
    %c0_15 = arith.constant 0 : index
    %c0_16 = arith.constant 0 : index
    %c0_17 = arith.constant 0 : index
    %38 = vector.load %arg2[%c0_15, %c0_16, %c0_17] : memref<16x128x128xbf16, #tpu.memory_space<vmem>>, vector<16x128x128xbf16>
    "tpu.trace_start"() <{level = 10 : i32, message = "cns,csh->cnh"}> : () -> ()
    %cst_18 = arith.constant dense<0.000000e+00> : vector<16x2x128xf32>
    %39 = tpu.matmul %37, %38, %cst_18 {dimension_numbers = #tpu.dot_dimension_numbers<[2], [1], [1], [2], [0, 0, 0, 1, 1, 2], [0], [0]>} : vector<16x2x128xbf16>, vector<16x128x128xbf16>, vector<16x2x128xf32> -> vector<16x2x128xf32>
    "tpu.trace_stop"() : () -> ()
    %cst_19 = arith.constant dense<0.000000e+00> : vector<2x128xf32>
    %40 = vector.multi_reduction <add>, %39, %cst_19 [0] : vector<16x2x128xf32> to vector<2x128xf32>
    %41 = vector.broadcast %4 : vector<1x128xf32> to vector<2x128xf32>
    %42 = arith.addf %40, %41 : vector<2x128xf32>
    %cst_20 = arith.constant 0.000000e+00 : f32
    %43 = vector.broadcast %cst_20 : f32 to vector<2x128xf32>
    %44 = arith.maximumf %42, %43 : vector<2x128xf32>
    %cst_21 = arith.constant dense<0.000000e+00> : vector<128xf32>
    %45 = vector.multi_reduction <add>, %44, %cst_21 [0] : vector<2x128xf32> to vector<128xf32>
    %46 = vector.shape_cast %45 : vector<128xf32> to vector<1x128xf32>
    %cst_22 = arith.constant 2.000000e+00 : f32
    %47 = vector.broadcast %cst_22 : f32 to vector<1x128xf32>
    %48 = arith.divf %46, %47 : vector<1x128xf32>
    %49 = vector.broadcast %48 : vector<1x128xf32> to vector<2x128xf32>
    %50 = arith.subf %44, %49 : vector<2x128xf32>
    %51 = arith.mulf %50, %50 : vector<2x128xf32>
    %cst_23 = arith.constant dense<0.000000e+00> : vector<128xf32>
    %52 = vector.multi_reduction <add>, %51, %cst_23 [0] : vector<2x128xf32> to vector<128xf32>
    %53 = vector.shape_cast %52 : vector<128xf32> to vector<1x128xf32>
    %cst_24 = arith.constant 2.000000e+00 : f32
    %54 = vector.broadcast %cst_24 : f32 to vector<1x128xf32>
    %55 = arith.divf %53, %54 : vector<1x128xf32>
    %cst_25 = arith.constant 9.99999974E-6 : f32
    %56 = vector.broadcast %cst_25 : f32 to vector<1x128xf32>
    %57 = arith.addf %55, %56 : vector<1x128xf32>
    %58 = math.rsqrt %57 : vector<1x128xf32>
    %59 = vector.broadcast %58 : vector<1x128xf32> to vector<2x128xf32>
    %60 = arith.mulf %50, %59 : vector<2x128xf32>
    %61 = arith.truncf %60 : vector<2x128xf32> to vector<2x128xbf16>
    %cst_26 = arith.constant dense<0.000000e+00> : vector<2x128xf32>
    %62 = tpu.matmul %61, %0, %cst_26 {dimension_numbers = #tpu.dot_dimension_numbers<[1], [0], [0], [1], [0, 0, 1, 1], [], []>} : vector<2x128xbf16>, vector<128x128xbf16>, vector<2x128xf32> -> vector<2x128xf32>
    %63 = vector.broadcast %5 : vector<1x128xf32> to vector<2x128xf32>
    %64 = arith.addf %62, %63 : vector<2x128xf32>
    %cst_27 = arith.constant 0.000000e+00 : f32
    %65 = vector.broadcast %cst_27 : f32 to vector<2x128xf32>
    %66 = arith.maximumf %64, %65 : vector<2x128xf32>
    %cst_28 = arith.constant dense<0.000000e+00> : vector<128xf32>
    %67 = vector.multi_reduction <add>, %66, %cst_28 [0] : vector<2x128xf32> to vector<128xf32>
    %68 = vector.shape_cast %67 : vector<128xf32> to vector<1x128xf32>
    %cst_29 = arith.constant 2.000000e+00 : f32
    %69 = vector.broadcast %cst_29 : f32 to vector<1x128xf32>
    %70 = arith.divf %68, %69 : vector<1x128xf32>
    %71 = vector.broadcast %70 : vector<1x128xf32> to vector<2x128xf32>
    %72 = arith.subf %66, %71 : vector<2x128xf32>
    %73 = arith.mulf %72, %72 : vector<2x128xf32>
    %cst_30 = arith.constant dense<0.000000e+00> : vector<128xf32>
    %74 = vector.multi_reduction <add>, %73, %cst_30 [0] : vector<2x128xf32> to vector<128xf32>
    %75 = vector.shape_cast %74 : vector<128xf32> to vector<1x128xf32>
    %cst_31 = arith.constant 2.000000e+00 : f32
    %76 = vector.broadcast %cst_31 : f32 to vector<1x128xf32>
    %77 = arith.divf %75, %76 : vector<1x128xf32>
    %cst_32 = arith.constant 9.99999974E-6 : f32
    %78 = vector.broadcast %cst_32 : f32 to vector<1x128xf32>
    %79 = arith.addf %77, %78 : vector<1x128xf32>
    %80 = math.rsqrt %79 : vector<1x128xf32>
    %81 = vector.broadcast %80 : vector<1x128xf32> to vector<2x128xf32>
    %82 = arith.mulf %72, %81 : vector<2x128xf32>
    %83 = arith.truncf %82 : vector<2x128xf32> to vector<2x128xbf16>
    %cst_33 = arith.constant dense<0.000000e+00> : vector<2x128xf32>
    %84 = tpu.matmul %83, %1, %cst_33 {dimension_numbers = #tpu.dot_dimension_numbers<[1], [0], [0], [1], [0, 0, 1, 1], [], []>} : vector<2x128xbf16>, vector<128x128xbf16>, vector<2x128xf32> -> vector<2x128xf32>
    %85 = vector.broadcast %6 : vector<1x128xf32> to vector<2x128xf32>
    %86 = arith.addf %84, %85 : vector<2x128xf32>
    %87 = vector.extract_strided_slice %86 {offsets = [0, 0], sizes = [2, 10], strides = [1, 1]} : vector<2x128xf32> to vector<2x10xf32>
    %c0_34 = arith.constant 0 : index
    %c0_35 = arith.constant 0 : index
    %88 = vector.load %arg5[%c0_34, %c0_35] : memref<2x10xf32, #tpu.memory_space<vmem>>, vector<2x10xf32>
    tpu.vector_store %arg5[%c0_34, %c0_35], %87 {strides = array<i32>} : memref<2x10xf32, #tpu.memory_space<vmem>>, vector<2x10xf32>,
    return
  }
  func.func @transform_0(%arg0: i32) -> (i32, i32) {
    %c0_i32 = arith.constant 0 : i32
    %c0_i32_0 = arith.constant 0 : i32
    %c0_i32_1 = arith.constant 0 : i32
    return %c0_i32, %c0_i32_0 : i32, i32
  }
  func.func @transform_1(%arg0: i32) -> (i32, i32, i32) {
    %c0_i32 = arith.constant 0 : i32
    %c0_i32_0 = arith.constant 0 : i32
    %c0_i32_1 = arith.constant 0 : i32
    %c0_i32_2 = arith.constant 0 : i32
    return %c0_i32, %c0_i32_0, %c0_i32_1 : i32, i32, i32
  }
  func.func @transform_2(%arg0: i32) -> (i32, i32) {
    %c0_i32 = arith.constant 0 : i32
    %c0_i32_0 = arith.constant 0 : i32
    %c0_i32_1 = arith.constant 0 : i32
    return %c0_i32, %c0_i32_0 : i32, i32
  }
  func.func @transform_3(%arg0: i32) -> (i32, i32) {
    %c0_i32 = arith.constant 0 : i32
    %c0_i32_0 = arith.constant 0 : i32
    %c0_i32_1 = arith.constant 0 : i32
    return %c0_i32, %c0_i32_0 : i32, i32
  }
  func.func @transform_4(%arg0: i32) -> (i32, i32) {
    %c0_i32 = arith.constant 0 : i32
    %c0_i32_0 = arith.constant 0 : i32
    %c0_i32_1 = arith.constant 0 : i32
    return %c0_i32, %c0_i32_0 : i32, i32
  }
}

</mosaic_0001>

<bundles_post_ra>
// kernel: ventral_pathway0_forward.1
= control target key start
LH: loop header
LB: loop body
LE: loop exit
PB: predicated region body
PF: predicated region fallthrough
CT: control target
= control target key end

     0   :  { %v3435_v8 = vmov 0   ;;  %vm185_vm0 = vcmask 1043456   ;;  %vm181_vm1 = vcmask 326656   ;;  %s4282_s0 = inlined_call_operand.vmem [shape: bf16[40,1024], index: 0, kind: input, shape index: {}]   ;;  %s4283_s1 = inlined_call_operand.vmem [shape: bf16[16,128,128], index: 1, kind: input, shape index: {}]   ;;  %s4284_s2 = inlined_call_operand.vmem [shape: bf16[272,128], index: 2, kind: input, shape index: {}]   ;;  %s4285_s3 = inlined_call_operand.vmem [shape: f32[8,128], index: 3, kind: input, shape index: {}]   ;;  %s4286_s4 = inlined_call_operand.hbm [shape: f32[2,10], index: 4, kind: output, shape index: {}]  }
   0x1   :  { %v56_v0 = vld [vmem:[%s4282_s0] sm:$0xff]  ;;  %v57_v2 = vld [vmem:[%s4282_s0 + $0x8] sm:$0xff]  ;;  %242 = vmatprep.mubr.bf16.mxu0 %v3435_v8  ;;  %285 = vmatprep.mubr.bf16.mxu1 %v3435_v8  ;;  %v58_v22 = vld [vmem:[%s4282_s0 + $0x10] sm:$0xff] }
   0x2   :  { %v60_v1 = vld [vmem:[%s4282_s0 + $0x20] sm:$0xff]  ;;  %v61_v4 = vld [vmem:[%s4282_s0 + $0x28] sm:$0xff]  ;;  %v62_v24 = vld [vmem:[%s4282_s0 + $0x30] sm:$0xff] }
   0x3   :  { %v2544_v3 = vcombine.high %v56_v0, %v60_v1  ;;  %v2543_v5 = vcombine.low %v56_v0, %v60_v1  ;;  %v64_v6 = vld [vmem:[%s4282_s0 + $0x40] sm:$0xff]  ;;  %v2546_v9 = vcombine.high %v57_v2, %v61_v4  ;;  %v2545_v10 = vcombine.low %v57_v2, %v61_v4  ;;  %v65_v12 = vld [vmem:[%s4282_s0 + $0x48] sm:$0xff]  ;;  %v59_v25 = vld [vmem:[%s4282_s0 + $0x18] sm:$0xff] }
   0x4   :  { %v68_v7 = vld [vmem:[%s4282_s0 + $0x60] sm:$0xff]  ;;  %v69_v13 = vld [vmem:[%s4282_s0 + $0x68] sm:$0xff]  ;;  %v63_v26 = vld [vmem:[%s4282_s0 + $0x38] sm:$0xff]  ;;  %v2548_v36 = vcombine.high %v58_v22, %v62_v24  ;;  %v2547_v42 = vcombine.low %v58_v22, %v62_v24 }
   0x5   :  { %v2552_v11 = vcombine.high %v64_v6, %v68_v7  ;;  %v72_v14 = vld [vmem:[%s4282_s0 + $0x80] sm:$0xff]  ;;  %210 = vmatprep.subr.bf16.mxu0 %v2544_v3  ;;  %v2554_v15 = vcombine.high %v65_v12, %v69_v13  ;;  %v73_v16 = vld [vmem:[%s4282_s0 + $0x88] sm:$0xff]  ;;  %253 = vmatprep.subr.bf16.mxu1 %v2546_v9  ;;  %v2551_v18 = vcombine.low %v64_v6, %v68_v7  ;;  %v74_v29 = vld [vmem:[%s4282_s0 + $0x90] sm:$0xff] }
   0x6   :  { %v2559_v17 = vcombine.low %v72_v14, %v72_v14  ;;  %211 = vmatpush1.bf16.msra.mxu0 %v2543_v5  ;;  %v2561_v19 = vcombine.low %v73_v16, %v73_v16  ;;  %254 = vmatpush1.bf16.msra.mxu1 %v2545_v10  ;;  %v2553_v20 = vcombine.low %v65_v12, %v69_v13  ;;  %v75_v30 = vld [vmem:[%s4282_s0 + $0x98] sm:$0xff]  ;;  %v66_v31 = vld [vmem:[%s4282_s0 + $0x50] sm:$0xff]  ;;  %v3254_v35 = vld [vmem:[%s4284_s2 + $0x80] sm:$0xff]  }
   0x7   :  { %212 = vmatprep.subr.bf16.mxu0 %v2552_v11  ;;  %v2560_v21 = vcombine.high %v72_v14, %v72_v14  ;;  %255 = vmatprep.subr.bf16.mxu1 %v2554_v15  ;;  %v2562_v23 = vcombine.high %v73_v16, %v73_v16  ;;  %v70_v32 = vld [vmem:[%s4282_s0 + $0x70] sm:$0xff]  ;;  %v2563_v33 = vcombine.low %v74_v29, %v74_v29  ;;  %v67_v37 = vld [vmem:[%s4282_s0 + $0x58] sm:$0xff] }
   0x8   :  { %v187_v27 = vsel %vm185_vm0, %v2559_v17, 0  ;;  %v193_v28 = vsel %vm185_vm0, %v2561_v19, 0  ;;  %v2565_v34 = vcombine.low %v75_v30, %v75_v30  ;;  %v71_v38 = vld [vmem:[%s4282_s0 + $0x78] sm:$0xff]  ;;  %v2550_v39 = vcombine.high %v59_v25, %v63_v26 }
   0x9   :  { %v199_v40 = vsel %vm185_vm0, %v2563_v33, 0  ;;  %v2549_v43 = vcombine.low %v59_v25, %v63_v26  ;;  %v2556_v44 = vcombine.high %v66_v31, %v70_v32  ;;  %v2558_v45 = vcombine.high %v67_v37, %v71_v38 }
   0xa   :  { %213 = vmatpush1.bf16.msra.mxu0 %v2551_v18  ;;  %256 = vmatpush1.bf16.msra.mxu1 %v2553_v20  ;;  %v205_v41 = vsel %vm185_vm0, %v2565_v34, 0  ;;  %v2555_v46 = vcombine.low %v66_v31, %v70_v32  ;;  %v2557_v47 = vcombine.low %v67_v37, %v71_v38  ;;  %v2564_v48 = vcombine.high %v74_v29, %v74_v29 }
   0xb   :  { %2567 = vmatprep.subr.msk.bf16.mxu0 %vm185_vm0, %v2560_v21  ;;  %2569 = vmatprep.subr.msk.bf16.mxu1 %vm185_vm0, %v2562_v23  ;;  %v2566_v49 = vcombine.high %v75_v30, %v75_v30 }
   0xe   :  { %215 = vmatpush1.bf16.msra.mxu0 %v187_v27  ;;  %258 = vmatpush1.bf16.msra.mxu1 %v193_v28 }
   0xf   :  { %296 = vmatprep.subr.bf16.mxu0 %v2548_v36  ;;  %339 = vmatprep.subr.bf16.mxu1 %v2550_v39 }
  0x11   :  { %2568 = vmatmul.mubr.msk.bf16.vlgmr.msra.gmra.mrb[0].mxu0 %vm181_vm1, %v3254_v35  ;;  %2570 = vmatmul.mubr.msk.bf16.vlgmr.msra.gmra.mrb[0].mxu1 %vm181_vm1, %v3254_v35 }
  0x12   :  { %297 = vmatpush1.bf16.msra.mxu0 %v2547_v42  ;;  %340 = vmatpush1.bf16.msra.mxu1 %v2549_v43 }
  0x13   :  { %298 = vmatprep.subr.bf16.mxu0 %v2556_v44  ;;  %341 = vmatprep.subr.bf16.mxu1 %v2558_v45 }
  0x14   :  { %328 = vmatprep.mubr.bf16.mxu0 %v3435_v8  ;;  %371 = vmatprep.mubr.bf16.mxu1 %v3435_v8 }
  0x16   :  { %299 = vmatpush1.bf16.msra.mxu0 %v2555_v46  ;;  %342 = vmatpush1.bf16.msra.mxu1 %v2557_v47 }
  0x17   :  { %2571 = vmatprep.subr.msk.bf16.mxu0 %vm185_vm0, %v2564_v48  ;;  %2573 = vmatprep.subr.msk.bf16.mxu1 %vm185_vm0, %v2566_v49 }
  0x1a   :  { %301 = vmatpush1.bf16.msra.mxu0 %v199_v40  ;;  %344 = vmatpush1.bf16.msra.mxu1 %v205_v41 }
  0x1d   :  { %2572 = vmatmul.mubr.msk.bf16.vlgmr.msra.gmra.mrb[4].mxu0 %vm181_vm1, %v3254_v35  ;;  %2574 = vmatmul.mubr.msk.bf16.vlgmr.msra.gmra.mrb[4].mxu1 %vm181_vm1, %v3254_v35 }
  0x1e   :  { %9 = vsyncpa [#allocation3], 0  ;;  %v3259_v50 = vld [vmem:[%s4283_s1] sm:$0xff]   ;;  %v3436_v51 = vmov 0.0   ;;  %v3261_v41 = vld [vmem:[%s4283_s1 + $0x8] sm:$0xff]   ;;  %vm3437_vm2 = vmmov 0  }
  0x1f   :  { %2884 = vmatprep.subr.bf16.mxu0 %v3436_v51  ;;  %2904 = vmatprep.subr.bf16.mxu1 %v3436_v51  ;;  %v3260_v40 = vld [vmem:[%s4283_s1 + $0x40] sm:$0xff]   ;;  %v3262_v42 = vld [vmem:[%s4283_s1 + $0x48] sm:$0xff]   ;;  %v3263_v43 = vld [vmem:[%s4283_s1 + $0x10] sm:$0xff]   ;;  %vm2258_vm3 = vcmask 1041408   ;;  %s3440_s25 = smov [#allocation2]   ;;  %vm2526_vm4 = vcmask 74752  }
  0x20   :  { %2885 = vmatpush3.bf16.msra.mxu0 %v3259_v50  ;;  %2905 = vmatpush3.bf16.msra.mxu1 %v3260_v40  ;;  %v3264_v44 = vld [vmem:[%s4283_s1 + $0x50] sm:$0xff]   ;;  %v3265_v45 = vld [vmem:[%s4283_s1 + $0x18] sm:$0xff]   ;;  %v3267_v47 = vld [vmem:[%s4283_s1 + $0x20] sm:$0xff]   ;;  %s2534_s26 = sshll.u32 %s3440_s25, 4  ;;  %s2535_s26 = int_to_ptr.vmem [resolvable:$true] %s2534_s26 }
  0x21   :  { %2886 = vmatprep.subr.bf16.mxu0 %v3436_v51  ;;  %2906 = vmatprep.subr.bf16.mxu1 %v3436_v51  ;;  %v3266_v46 = vld [vmem:[%s4283_s1 + $0x58] sm:$0xff]   ;;  %v3268_v48 = vld [vmem:[%s4283_s1 + $0x60] sm:$0xff]   ;;  %v3269_v49 = vld [vmem:[%s4283_s1 + $0x28] sm:$0xff]   ;;  %s3411_s27 = scalar_lea.vmem %s2535_s26, 32  ;;  %p3416_p1 = scmp.lt.s32.totalorder %s2535_s26, %s2535_s26 }
  0x22   :  { %v3270_v50 = vld [vmem:[%s4283_s1 + $0x68] sm:$0xff]   ;;  %2900 = vmatprep.mubr.msk.bf16.mxu0 %vm3437_vm2, %v3436_v51  ;;  %2920 = vmatprep.mubr.msk.bf16.mxu1 %vm3437_vm2, %v3436_v51  ;;  %v3275_v40 = vld [vmem:[%s4283_s1 + $0x80] sm:$0xff]   ;;  %p3412_p0 = scmp.ne.s32.totalorder %s2535_s26, %s3411_s27  ;;  %p3417_p2 = scmp.lt.s32.totalorder %s3411_s27, %s3411_s27 }
  0x24   :  { %2887 = vmatpush3.bf16.msra.mxu0 %v3261_v41  ;;  %2907 = vmatpush3.bf16.msra.mxu1 %v3262_v42  ;;  %p3418_p3 = por %p3417_p2, %p3416_p1 }
  0x25   :  { %2888 = vmatprep.subr.bf16.mxu0 %v3436_v51  ;;  %2908 = vmatprep.subr.bf16.mxu1 %v3436_v51 }
  0x26   :  { %p3419_p4 = pnand %p3418_p3, %p3412_p0 }
  0x28   :  { %2889 = vmatpush3.bf16.msra.mxu0 %v3263_v43  ;;  %2909 = vmatpush3.bf16.msra.mxu1 %v3264_v44 }
  0x29   :  { %2890 = vmatprep.subr.bf16.mxu0 %v3436_v51  ;;  %2910 = vmatprep.subr.bf16.mxu1 %v3436_v51 }
  0x2c   :  { %2891 = vmatpush3.bf16.msra.mxu0 %v3265_v45  ;;  %2911 = vmatpush3.bf16.msra.mxu1 %v3266_v46 }
  0x2d   :  { %2892 = vmatprep.subr.bf16.mxu0 %v3436_v51  ;;  %2912 = vmatprep.subr.bf16.mxu1 %v3436_v51 }
  0x30   :  { %2893 = vmatpush3.bf16.msra.mxu0 %v3267_v47  ;;  %2913 = vmatpush3.bf16.msra.mxu1 %v3268_v48  ;;  %v3276_v47 = vld [vmem:[%s4283_s1 + $0xc0] sm:$0xff]  }
  0x31   :  { %2894 = vmatprep.subr.bf16.mxu0 %v3436_v51  ;;  %2914 = vmatprep.subr.bf16.mxu1 %v3436_v51 }
  0x34   :  { %2895 = vmatpush3.bf16.msra.mxu0 %v3269_v49  ;;  %2915 = vmatpush3.bf16.msra.mxu1 %v3270_v50 }
  0x35   :  { %2896 = vmatprep.subr.bf16.mxu0 %v3436_v51  ;;  %2916 = vmatprep.subr.bf16.mxu1 %v3436_v51 }
  0xe4   :  { %v244_v52 = vpop.f32.mrb[0].mxu0  ;;  %v287_v54 = vpop.f32.mrb[0].mxu1 }
  0xe5   :  { %v382_v53 = vmax.f32 %v244_v52, 0.0  ;;  %v246_v55 = vpop.f32.mrb[1].mxu0  ;;  %v384_v56 = vmax.f32 %v287_v54, 0.0  ;;  %v289_v58 = vpop.f32.mrb[1].mxu1  ;;  %v3271_v52 = vld [vmem:[%s4283_s1 + $0x30] sm:$0xff]   ;;  %v3273_v54 = vld [vmem:[%s4283_s1 + $0x38] sm:$0xff]  }
  0xe6   :  { %v383_v57 = vmax.f32 %v246_v55, 0.0  ;;  %v248_v59 = vpop.f32.mrb[2].mxu0  ;;  %v385_v60 = vmax.f32 %v289_v58, 0.0  ;;  %v291_v62 = vpop.f32.mrb[2].mxu1  ;;  %2897 = vmatpush3.bf16.msra.mxu0 %v3271_v52  ;;  %v3274_v55 = vld [vmem:[%s4283_s1 + $0x78] sm:$0xff]  }
  0xe7   :  { %v390_v61 = vmax.f32 %v248_v59, 0.0  ;;  %v250_v63 = vpop.f32.mrb[3].mxu0  ;;  %v398_v0 = vadd.f32 %v384_v56, %v382_v53  ;;  %v392_v1 = vmax.f32 %v291_v62, 0.0  ;;  %v293_v3 = vpop.f32.mrb[3].mxu1  ;;  %v3272_v53 = vld [vmem:[%s4283_s1 + $0x70] sm:$0xff]   ;;  %2898 = vmatprep.subr.bf16.mxu0 %v3436_v51 }
  0xe8   :  { %v391_v2 = vmax.f32 %v250_v63, 0.0  ;;  %v399_v4 = vadd.f32 %v385_v60, %v383_v57  ;;  %v393_v5 = vmax.f32 %v293_v3, 0.0  ;;  %2917 = vmatpush3.bf16.msra.mxu1 %v3272_v53 }
  0xe9   :  { %v400_v6 = vadd.f32 %v392_v1, %v390_v61  ;;  %2918 = vmatprep.subr.bf16.mxu1 %v3436_v51 }
  0xea   :  { %v401_v7 = vadd.f32 %v393_v5, %v391_v2  ;;  %2899 = vmatpush3.bf16.msra.mxu0 %v3273_v54 }
  0xeb   :  { %2924 = vmatprep.subr.bf16.mxu0 %v3436_v51 }
  0xec   :  { %2919 = vmatpush3.bf16.msra.mxu1 %v3274_v55 }
  0xed   :  { %2944 = vmatprep.subr.bf16.mxu1 %v3436_v51 }
  0xf0   :  { %v330_v8 = vpop.f32.mrb[4].mxu0  ;;  %v373_v10 = vpop.f32.mrb[4].mxu1 }
  0xf1   :  { %v386_v9 = vmax.f32 %v330_v8, 0.0  ;;  %v332_v11 = vpop.f32.mrb[5].mxu0  ;;  %v388_v12 = vmax.f32 %v373_v10, 0.0  ;;  %v375_v14 = vpop.f32.mrb[5].mxu1  ;;  %v450_v8 = vlaneseq }
  0xf2   :  { %v387_v13 = vmax.f32 %v332_v11, 0.0  ;;  %v334_v15 = vpop.f32.mrb[6].mxu0  ;;  %v389_v17 = vmax.f32 %v375_v14, 0.0  ;;  %v377_v19 = vpop.f32.mrb[6].mxu1 }
  0xf3   :  { %v402_v16 = vadd.f32 %v398_v0, %v386_v9  ;;  %v394_v18 = vmax.f32 %v334_v15, 0.0  ;;  %v336_v20 = vpop.f32.mrb[7].mxu0  ;;  %v379_v23 = vpop.f32.mrb[7].mxu1  ;;  %v396_v26 = vmax.f32 %v377_v19, 0.0  ;;  %v3439_v9 = vmov 1934713408  }
  0xf4   :  { %v403_v21 = vadd.f32 %v399_v4, %v387_v13  ;;  %v395_v22 = vmax.f32 %v336_v20, 0.0  ;;  %v397_v29 = vmax.f32 %v379_v23, 0.0  ;;  %v479_v10 = vunpack.c.l.s4 %v3439_v9  ;;  %v3290_v9 = vld [vmem:[%s4283_s1 + $0xf8] sm:$0xff]  }
  0xf5   :  { %v3551_v24 = vadd.f32 %v402_v16, %v388_v12  ;;  %v404_v25 = vadd.f32 %v400_v6, %v394_v18  ;;  %v3438_v6 = vmov 1983009808   ;;  %v451_v12 = vshrl.u32 %v450_v8, 7  ;;  %v3289_v8 = vld [vmem:[%s4283_s1 + $0xb8] sm:$0xff]  }
  0xf6   :  { %v3553_v27 = vadd.f32 %v403_v21, %v389_v17  ;;  %v405_v28 = vadd.f32 %v401_v7, %v395_v22  ;;  %v448_v7 = vunpack.c.l.s4 %v3438_v6  ;;  %v480_v13 = vunpack.c.0.s8 %v479_v10  ;;  %v3288_v6 = vld [vmem:[%s4283_s1 + $0xf0] sm:$0xff]  }
  0xf7   :  { %v3555_v30 = vadd.f32 %v404_v25, %v396_v26  ;;  %v418_v33 = vmul.f32 %v3551_v24, %v3551_v24 }
  0xf8   :  { %v3557_v31 = vadd.f32 %v405_v28, %v397_v29  ;;  %v410_v32 = vadd.f32 %v3553_v27, %v3551_v24  ;;  %v419_v34 = vmul.f32 %v3553_v27, %v3553_v27  ;;  %v449_v11 = vunpack.c.0.s8 %v448_v7 }
  0xf9   :  { %v420_v36 = vmul.f32 %v3555_v30, %v3555_v30  ;;  %v3639_v23 = vsub.s32 %v480_v13, %v451_v12  ;;  %v3292_v13 = vld [vmem:[%s4283_s1 + $0x140] sm:$0xff]  }
  0xfa   :  { %411 = vadd.xlane.f32.xlu0 %v410_v32  ;;  %v413_v35 = vadd.f32 %v3557_v31, %v3555_v30  ;;  %v421_v37 = vmul.f32 %v3557_v31, %v3557_v31  ;;  %v422_v38 = vadd.f32 %v419_v34, %v418_v33  ;;  %v452_v16 = vsub.s32 %v449_v11, %v451_v12  ;;  %v3291_v11 = vld [vmem:[%s4283_s1 + $0x100] sm:$0xff]  }
  0xfc   :  { %414 = vadd.xlane.f32.xlu1 %v413_v35  ;;  %v425_v39 = vadd.f32 %v421_v37, %v420_v36 }
  0xfe   :  { %423 = vadd.xlane.f32.xlu0 %v422_v38 }
 0x100   :  { %426 = vadd.xlane.f32.xlu1 %v425_v39 }
 0x187   :  { %v412_v56 = vpop.xlane.xlu0 %411 }
 0x188   :  { %v416_v57 = vmul.f32 0.010204081, %v412_v56  ;;  %v3277_v56 = vld [vmem:[%s4283_s1 + $0x88] sm:$0xff]  }
 0x189   :  { %v415_v58 = vpop.xlane.xlu1 %414 }
 0x18a   :  { %v417_v59 = vmul.f32 0.010204081, %v415_v58  ;;  %v430_v61 = vmul.f32 %v416_v57, %v416_v57  ;;  %v434_v14 = vsub.f32 %v3551_v24, %v416_v57  ;;  %v435_v15 = vsub.f32 %v3553_v27, %v416_v57  ;;  %v3278_v57 = vld [vmem:[%s4283_s1 + $0xc8] sm:$0xff]  }
 0x18b   :  { %v424_v60 = vpop.xlane.xlu0 %423 }
 0x18c   :  { %v428_v62 = vmul.f32 0.010204081, %v424_v60  ;;  %v431_v1 = vmul.f32 %v417_v59, %v417_v59  ;;  %v436_v18 = vsub.f32 %v3555_v30, %v417_v59  ;;  %v437_v19 = vsub.f32 %v3557_v31, %v417_v59  ;;  %v3279_v60 = vld [vmem:[%s4283_s1 + $0x90] sm:$0xff]  }
 0x18d   :  { %v427_v63 = vpop.xlane.xlu1 %426 }
 0x18e   :  { %v432_v0 = vsub.f32 %v428_v62, %v430_v61  ;;  %v429_v2 = vmul.f32 0.010204081, %v427_v63  ;;  %v3280_v61 = vld [vmem:[%s4283_s1 + $0xd0] sm:$0xff]   ;;  %v3281_v62 = vld [vmem:[%s4283_s1 + $0x98] sm:$0xff]  }
 0x18f   :  { %v3282_v63 = vld [vmem:[%s4283_s1 + $0xd8] sm:$0xff]  }
 0x190   :  { %v438_v3 = vadd.f32 1e-05, %v432_v0  ;;  %v433_v4 = vsub.f32 %v429_v2, %v431_v1  ;;  %v3283_v0 = vld [vmem:[%s4283_s1 + $0xa0] sm:$0xff]   ;;  %v3285_v2 = vld [vmem:[%s4283_s1 + $0xa8] sm:$0xff]  }
 0x191   :  { %v3284_v1 = vld [vmem:[%s4283_s1 + $0xe0] sm:$0xff]  }
 0x192   :  { %3403 = vrsqrt.f32 %v438_v3  ;;  %v439_v5 = vadd.f32 1e-05, %v433_v4  ;;  %v3286_v3 = vld [vmem:[%s4283_s1 + $0xe8] sm:$0xff]  }
 0x194   :  { %3405 = vrsqrt.f32 %v439_v5  ;;  %v3287_v5 = vld [vmem:[%s4283_s1 + $0xb0] sm:$0xff]  }
 0x19c   :  { %v3404_v17 = vpop.eup %3403 }
 0x19d   :  { %v442_v20 = vmul.f32 %v3404_v17, %v434_v14  ;;  %v443_v21 = vmul.f32 %v3404_v17, %v435_v15  ;;  %v3293_v15 = vld [vmem:[%s4283_s1 + $0x108] sm:$0xff]   ;;  %v3295_v17 = vld [vmem:[%s4283_s1 + $0x110] sm:$0xff]  }
 0x19e   :  { %v3406_v22 = vpop.eup %3405 }
 0x19f   :  { %v444_v25 = vmul.f32 %v3406_v22, %v436_v18  ;;  %v445_v26 = vmul.f32 %v3406_v22, %v437_v19  ;;  %v3641_v28 = vrot.slane %v442_v20, %v452_v16  ;;  %v3643_v29 = vrot.slane %v443_v21, %v452_v16  ;;  %v3296_v18 = vld [vmem:[%s4283_s1 + $0x150] sm:$0xff]   ;;  %v3297_v19 = vld [vmem:[%s4283_s1 + $0x118] sm:$0xff]   ;;  %v3300_v22 = vld [vmem:[%s4283_s1 + $0x160] sm:$0xff]  }
 0x1a0   :  { %v446_v24 = vcombine.high %v442_v20, %v3436_v51  ;;  %v461_v27 = vcombine.high %v443_v21, %v3436_v51  ;;  %v3298_v20 = vld [vmem:[%s4283_s1 + $0x158] sm:$0xff]   ;;  %v3299_v21 = vld [vmem:[%s4283_s1 + $0x120] sm:$0xff]  }
 0x1a1   :  { %v476_v30 = vcombine.low %v3641_v28, %v3643_v29  ;;  %v519_v32 = vrot.slane %v444_v25, %v452_v16  ;;  %v534_v31 = vrot.slane %v445_v26, %v452_v16  ;;  %v512_v35 = vcombine.high %v444_v25, %v3436_v51  ;;  %v3302_v25 = vld [vmem:[%s4283_s1 + $0x168] sm:$0xff]  }
 0x1a2   :  { %v460_v33 = vrot.slane %v446_v24, %v452_v16  ;;  %v475_v34 = vrot.slane %v461_v27, %v452_v16  ;;  %v527_v36 = vcombine.high %v445_v26, %v3436_v51  ;;  %v477_v4 = vcombine.high %v3641_v28, %v3643_v29  ;;  %v3303_v26 = vld [vmem:[%s4283_s1 + $0x130] sm:$0xff]   ;;  %v3305_v29 = vld [vmem:[%s4283_s1 + $0x138] sm:$0xff]  }
 0x1a3   :  { %v484_v37 = vrot.slane %v476_v30, %v3639_v23  ;;  %v542_v38 = vcombine.low %v519_v32, %v534_v31  ;;  %v543_v39 = vcombine.high %v519_v32, %v534_v31  ;;  %v526_v43 = vrot.slane %v512_v35, %v452_v16  ;;  %v3304_v28 = vld [vmem:[%s4283_s1 + $0x170] sm:$0xff]   ;;  %v3306_v24 = vld [vmem:[%s4283_s1 + $0x178] sm:$0xff]   ;;  %v3307_v30 = vld [vmem:[%s4283_s1 + $0x180] sm:$0xff]  }
 0x1a4   :  { %v492_v41 = vcombine.low %v460_v33, %v475_v34  ;;  %v493_v42 = vcombine.high %v460_v33, %v475_v34  ;;  %v541_v44 = vrot.slane %v527_v36, %v452_v16  ;;  %v491_v7 = vrot.slane %v477_v4, %v3639_v23  ;;  %v3294_v16 = vld [vmem:[%s4283_s1 + $0x148] sm:$0xff]   ;;  %v3308_v31 = vld [vmem:[%s4283_s1 + $0x1c0] sm:$0xff]   ;;  %v3311_v36 = vld [vmem:[%s4283_s1 + $0x190] sm:$0xff]  }
 0x1a5   :  { %v578_v45 = vpack.c.bf16 %v484_v37, %v484_v37  ;;  %v508_v46 = vcombine.high %v484_v37, %v3436_v51  ;;  %v3666_v50 = vrot.slane %v542_v38, %v3639_v23  ;;  %v3669_v52 = vrot.slane %v543_v39, %v3639_v23  ;;  %v3309_v34 = vld [vmem:[%s4283_s1 + $0x188] sm:$0xff]   ;;  %v3312_v37 = vld [vmem:[%s4283_s1 + $0x1d0] sm:$0xff]   ;;  %v3313_v38 = vld [vmem:[%s4283_s1 + $0x198] sm:$0xff]  }
 0x1a6   :  { %v3660_v48 = vrot.slane %v492_v41, %v3639_v23  ;;  %v3663_v49 = vrot.slane %v493_v42, %v3639_v23  ;;  %v558_v54 = vcombine.low %v526_v43, %v541_v44  ;;  %v559_v55 = vcombine.high %v526_v43, %v541_v44  ;;  %v3310_v35 = vld [vmem:[%s4283_s1 + $0x1c8] sm:$0xff]   ;;  %v3314_v39 = vld [vmem:[%s4283_s1 + $0x1d8] sm:$0xff]   ;;  %v3316_v41 = vld [vmem:[%s4283_s1 + $0x1e0] sm:$0xff]  }
 0x1a7   :  { %2901 = vmatmul.mubr.bf16.vlgmr.msra.gmra.mrb[8].mxu0 %v578_v45  ;;  %v579_v53 = vpack.c.bf16 %v508_v46, %v508_v46  ;;  %v509_v10 = vcombine.high %v491_v7, %v3436_v51  ;;  %v580_v12 = vpack.c.bf16 %v491_v7, %v491_v7  ;;  %v3317_v42 = vld [vmem:[%s4283_s1 + $0x1a8] sm:$0xff]   ;;  %v3319_v44 = vld [vmem:[%s4283_s1 + $0x1b0] sm:$0xff]   ;;  %v3321_v46 = vld [vmem:[%s4283_s1 + $0x1b8] sm:$0xff]  }
 0x1a8   :  { %2925 = vmatpush3.bf16.msra.mxu0 %v3275_v40  ;;  %2940 = vmatprep.mubr.msk.bf16.mxu0 %vm3437_vm2, %v3436_v51  ;;  %v3684_v58 = vrot.slane %v558_v54, %v3639_v23  ;;  %v3687_v59 = vrot.slane %v559_v55, %v3639_v23  ;;  %v3301_v23 = vld [vmem:[%s4283_s1 + $0x128] sm:$0xff]   ;;  %v510_v27 = vcombine.high %v3660_v48, %v3436_v51  ;;  %v3315_v40 = vld [vmem:[%s4283_s1 + $0x1a0] sm:$0xff]   ;;  %v3320_v45 = vld [vmem:[%s4283_s1 + $0x1f0] sm:$0xff]  }
 0x1a9   :  { %2921 = vmatmul.mubr.bf16.vlgmr.msra.gmra.mrb[8].mxu1 %v579_v53  ;;  %2926 = vmatprep.subr.bf16.mxu0 %v3436_v51  ;;  %v581_v14 = vpack.c.bf16 %v509_v10, %v509_v10  ;;  %v582_v32 = vpack.c.bf16 %v3660_v48, %v3660_v48  ;;  %v3318_v43 = vld [vmem:[%s4283_s1 + $0x1e8] sm:$0xff]   ;;  %v511_v48 = vcombine.high %v3663_v49, %v3436_v51  ;;  %v3323_v53 = vld [vmem:[%s4283_s1 + $0x200] sm:$0xff]   ;;  %v3335_v4 = vld [vmem:[%s4283_s1 + $0x230] sm:$0xff]  }
 0x1aa   :  { %2945 = vmatpush3.bf16.msra.mxu1 %v3276_v47  ;;  %2960 = vmatprep.mubr.msk.bf16.mxu1 %vm3437_vm2, %v3436_v51  ;;  %v583_v33 = vpack.c.bf16 %v510_v27, %v510_v27  ;;  %v3322_v47 = vld [vmem:[%s4283_s1 + $0x1f8] sm:$0xff]   ;;  %v584_v54 = vpack.c.bf16 %v3663_v49, %v3663_v49  ;;  %v3324_v55 = vld [vmem:[%s4283_s1 + $0x240] sm:$0xff]   ;;  %v3326_v49 = vld [vmem:[%s4283_s1 + $0x248] sm:$0xff]   ;;  %v586_v10 = vpack.c.bf16 %v3666_v50, %v3666_v50 }
 0x1ab   :  { %2946 = vmatprep.subr.bf16.mxu1 %v3436_v51  ;;  %v3338_v7 = vld [vmem:[%s4283_s1 + $0x278] sm:$0xff]   ;;  %v3356_v27 = vld [vmem:[%s4283_s1 + $0x340] sm:$0xff]  }
 0x1ac   :  { %2927 = vmatpush3.bf16.msra.mxu0 %v3277_v56  ;;  %v585_v56 = vpack.c.bf16 %v511_v48, %v511_v48 }
 0x1ad   :  { %2928 = vmatprep.subr.bf16.mxu0 %v3436_v51 }
 0x1ae   :  { %2947 = vmatpush3.bf16.msra.mxu1 %v3278_v57  ;;  %v3325_v57 = vld [vmem:[%s4283_s1 + $0x208] sm:$0xff]  }
 0x1af   :  { %2948 = vmatprep.subr.bf16.mxu1 %v3436_v51 }
 0x1b0   :  { %2929 = vmatpush3.bf16.msra.mxu0 %v3279_v60  ;;  %v3327_v60 = vld [vmem:[%s4283_s1 + $0x210] sm:$0xff]  }
 0x1b1   :  { %2930 = vmatprep.subr.bf16.mxu0 %v3436_v51 }
 0x1b2   :  { %2949 = vmatpush3.bf16.msra.mxu1 %v3280_v61  ;;  %v3328_v61 = vld [vmem:[%s4283_s1 + $0x250] sm:$0xff]  }
 0x1b3   :  { %2950 = vmatprep.subr.bf16.mxu1 %v3436_v51 }
 0x1b4   :  { %2931 = vmatpush3.bf16.msra.mxu0 %v3281_v62  ;;  %v3329_v62 = vld [vmem:[%s4283_s1 + $0x218] sm:$0xff]  }
 0x1b5   :  { %2932 = vmatprep.subr.bf16.mxu0 %v3436_v51 }
 0x1b6   :  { %2951 = vmatpush3.bf16.msra.mxu1 %v3282_v63  ;;  %v3330_v63 = vld [vmem:[%s4283_s1 + $0x258] sm:$0xff]  }
 0x1b7   :  { %2952 = vmatprep.subr.bf16.mxu1 %v3436_v51 }
 0x1b8   :  { %2933 = vmatpush3.bf16.msra.mxu0 %v3283_v0  ;;  %v3331_v0 = vld [vmem:[%s4283_s1 + $0x220] sm:$0xff]  }
 0x1b9   :  { %2934 = vmatprep.subr.bf16.mxu0 %v3436_v51 }
 0x1ba   :  { %2953 = vmatpush3.bf16.msra.mxu1 %v3284_v1  ;;  %v3332_v1 = vld [vmem:[%s4283_s1 + $0x260] sm:$0xff]  }
 0x1bb   :  { %2954 = vmatprep.subr.bf16.mxu1 %v3436_v51 }
 0x1bc   :  { %2935 = vmatpush3.bf16.msra.mxu0 %v3285_v2  ;;  %v3333_v2 = vld [vmem:[%s4283_s1 + $0x228] sm:$0xff]  }
 0x1bd   :  { %2936 = vmatprep.subr.bf16.mxu0 %v3436_v51 }
 0x1be   :  { %2955 = vmatpush3.bf16.msra.mxu1 %v3286_v3  ;;  %v3334_v3 = vld [vmem:[%s4283_s1 + $0x268] sm:$0xff]  }
 0x1bf   :  { %2956 = vmatprep.subr.bf16.mxu1 %v3436_v51 }
 0x1c0   :  { %2937 = vmatpush3.bf16.msra.mxu0 %v3287_v5  ;;  %v3336_v5 = vld [vmem:[%s4283_s1 + $0x270] sm:$0xff]  }
 0x1c1   :  { %2938 = vmatprep.subr.bf16.mxu0 %v3436_v51 }
 0x1c2   :  { %2957 = vmatpush3.bf16.msra.mxu1 %v3288_v6  ;;  %v3337_v6 = vld [vmem:[%s4283_s1 + $0x238] sm:$0xff]  }
 0x1c3   :  { %2958 = vmatprep.subr.bf16.mxu1 %v3436_v51 }
 0x1c4   :  { %2939 = vmatpush3.bf16.msra.mxu0 %v3289_v8  ;;  %v574_v8 = vcombine.high %v3666_v50, %v3436_v51  ;;  %v3342_v50 = vld [vmem:[%s4283_s1 + $0x2c8] sm:$0xff]  }
 0x1c5   :  { %2964 = vmatprep.subr.bf16.mxu0 %v3436_v51 }
 0x1c6   :  { %2959 = vmatpush3.bf16.msra.mxu1 %v3290_v9  ;;  %v3339_v9 = vld [vmem:[%s4283_s1 + $0x280] sm:$0xff]  }
 0x1c7   :  { %2941 = vmatmul.mubr.bf16.vlgmr.msra.gmra.mrb[12].mxu0 %v580_v12  ;;  %2984 = vmatprep.subr.bf16.mxu1 %v3436_v51  ;;  %v587_v12 = vpack.c.bf16 %v574_v8, %v574_v8 }
 0x1c8   :  { %2965 = vmatpush3.bf16.msra.mxu0 %v3291_v11  ;;  %2980 = vmatprep.mubr.msk.bf16.mxu0 %vm3437_vm2, %v3436_v51  ;;  %v3340_v11 = vld [vmem:[%s4283_s1 + $0x2c0] sm:$0xff]  }
 0x1c9   :  { %2961 = vmatmul.mubr.bf16.vlgmr.msra.gmra.mrb[12].mxu1 %v581_v14  ;;  %2966 = vmatprep.subr.bf16.mxu0 %v3436_v51  ;;  %v3343_v14 = vld [vmem:[%s4283_s1 + $0x290] sm:$0xff]  }
 0x1ca   :  { %2985 = vmatpush3.bf16.msra.mxu1 %v3292_v13  ;;  %3000 = vmatprep.mubr.msk.bf16.mxu1 %vm3437_vm2, %v3436_v51  ;;  %v3341_v13 = vld [vmem:[%s4283_s1 + $0x288] sm:$0xff]  }
 0x1cb   :  { %2986 = vmatprep.subr.bf16.mxu1 %v3436_v51 }
 0x1cc   :  { %2967 = vmatpush3.bf16.msra.mxu0 %v3293_v15  ;;  %v3344_v15 = vld [vmem:[%s4283_s1 + $0x2d0] sm:$0xff]  }
 0x1cd   :  { %2968 = vmatprep.subr.bf16.mxu0 %v3436_v51 }
 0x1ce   :  { %2987 = vmatpush3.bf16.msra.mxu1 %v3294_v16  ;;  %v3345_v16 = vld [vmem:[%s4283_s1 + $0x298] sm:$0xff]  }
 0x1cf   :  { %2988 = vmatprep.subr.bf16.mxu1 %v3436_v51 }
 0x1d0   :  { %2969 = vmatpush3.bf16.msra.mxu0 %v3295_v17  ;;  %v3346_v17 = vld [vmem:[%s4283_s1 + $0x2d8] sm:$0xff]  }
 0x1d1   :  { %2970 = vmatprep.subr.bf16.mxu0 %v3436_v51 }
 0x1d2   :  { %2989 = vmatpush3.bf16.msra.mxu1 %v3296_v18  ;;  %v3347_v18 = vld [vmem:[%s4283_s1 + $0x2a0] sm:$0xff]  }
 0x1d3   :  { %2990 = vmatprep.subr.bf16.mxu1 %v3436_v51 }
 0x1d4   :  { %2971 = vmatpush3.bf16.msra.mxu0 %v3297_v19  ;;  %v3348_v19 = vld [vmem:[%s4283_s1 + $0x2e0] sm:$0xff]  }
 0x1d5   :  { %2972 = vmatprep.subr.bf16.mxu0 %v3436_v51 }
 0x1d6   :  { %2991 = vmatpush3.bf16.msra.mxu1 %v3298_v20  ;;  %v3349_v20 = vld [vmem:[%s4283_s1 + $0x2a8] sm:$0xff]  }
 0x1d7   :  { %2992 = vmatprep.subr.bf16.mxu1 %v3436_v51 }
 0x1d8   :  { %2973 = vmatpush3.bf16.msra.mxu0 %v3299_v21  ;;  %v3350_v21 = vld [vmem:[%s4283_s1 + $0x2e8] sm:$0xff]  }
 0x1d9   :  { %2974 = vmatprep.subr.bf16.mxu0 %v3436_v51 }
 0x1da   :  { %2993 = vmatpush3.bf16.msra.mxu1 %v3300_v22  ;;  %v3351_v22 = vld [vmem:[%s4283_s1 + $0x2b0] sm:$0xff]  }
 0x1db   :  { %2994 = vmatprep.subr.bf16.mxu1 %v3436_v51 }
 0x1dc   :  { %2975 = vmatpush3.bf16.msra.mxu0 %v3301_v23  ;;  %v3352_v23 = vld [vmem:[%s4283_s1 + $0x2f0] sm:$0xff]  }
 0x1dd   :  { %2976 = vmatprep.subr.bf16.mxu0 %v3436_v51 }
 0x1de   :  { %2995 = vmatpush3.bf16.msra.mxu1 %v3302_v25  ;;  %v3353_v25 = vld [vmem:[%s4283_s1 + $0x2b8] sm:$0xff]  }
 0x1df   :  { %2996 = vmatprep.subr.bf16.mxu1 %v3436_v51 }
 0x1e0   :  { %2977 = vmatpush3.bf16.msra.mxu0 %v3303_v26  ;;  %v3354_v26 = vld [vmem:[%s4283_s1 + $0x2f8] sm:$0xff]  }
 0x1e1   :  { %2978 = vmatprep.subr.bf16.mxu0 %v3436_v51 }
 0x1e2   :  { %2997 = vmatpush3.bf16.msra.mxu1 %v3304_v28  ;;  %v575_v28 = vcombine.high %v3669_v52, %v3436_v51 }
 0x1e3   :  { %2998 = vmatprep.subr.bf16.mxu1 %v3436_v51 }
 0x1e4   :  { %2979 = vmatpush3.bf16.msra.mxu0 %v3305_v29  ;;  %v3355_v29 = vld [vmem:[%s4283_s1 + $0x300] sm:$0xff]  }
 0x1e5   :  { %3004 = vmatprep.subr.bf16.mxu0 %v3436_v51 }
 0x1e6   :  { %2999 = vmatpush3.bf16.msra.mxu1 %v3306_v24  ;;  %v588_v24 = vpack.c.bf16 %v3669_v52, %v3669_v52  ;;  %v3358_v52 = vld [vmem:[%s4283_s1 + $0x348] sm:$0xff]  }
 0x1e7   :  { %2981 = vmatmul.mubr.bf16.vlgmr.msra.gmra.mrb[16].mxu0 %v582_v32  ;;  %3024 = vmatprep.subr.bf16.mxu1 %v3436_v51  ;;  %v3357_v32 = vld [vmem:[%s4283_s1 + $0x308] sm:$0xff]  }
 0x1e8   :  { %3005 = vmatpush3.bf16.msra.mxu0 %v3307_v30  ;;  %3020 = vmatprep.mubr.msk.bf16.mxu0 %vm3437_vm2, %v3436_v51  ;;  %v589_v30 = vpack.c.bf16 %v575_v28, %v575_v28 }
 0x1e9   :  { %3001 = vmatmul.mubr.bf16.vlgmr.msra.gmra.mrb[16].mxu1 %v583_v33  ;;  %3006 = vmatprep.subr.bf16.mxu0 %v3436_v51  ;;  %v3360_v33 = vld [vmem:[%s4283_s1 + $0x350] sm:$0xff]  }
 0x1ea   :  { %3025 = vmatpush3.bf16.msra.mxu1 %v3308_v31  ;;  %3040 = vmatprep.mubr.msk.bf16.mxu1 %vm3437_vm2, %v3436_v51  ;;  %v3359_v31 = vld [vmem:[%s4283_s1 + $0x310] sm:$0xff]  }
 0x1eb   :  { %3026 = vmatprep.subr.bf16.mxu1 %v3436_v51 }
 0x1ec   :  { %3007 = vmatpush3.bf16.msra.mxu0 %v3309_v34  ;;  %v3361_v34 = vld [vmem:[%s4283_s1 + $0x318] sm:$0xff]  }
 0x1ed   :  { %3008 = vmatprep.subr.bf16.mxu0 %v3436_v51 }
 0x1ee   :  { %3027 = vmatpush3.bf16.msra.mxu1 %v3310_v35  ;;  %v3362_v35 = vld [vmem:[%s4283_s1 + $0x358] sm:$0xff]  }
 0x1ef   :  { %3028 = vmatprep.subr.bf16.mxu1 %v3436_v51 }
 0x1f0   :  { %3009 = vmatpush3.bf16.msra.mxu0 %v3311_v36  ;;  %v3363_v36 = vld [vmem:[%s4283_s1 + $0x320] sm:$0xff]  }
 0x1f1   :  { %3010 = vmatprep.subr.bf16.mxu0 %v3436_v51 }
 0x1f2   :  { %3029 = vmatpush3.bf16.msra.mxu1 %v3312_v37  ;;  %v3364_v37 = vld [vmem:[%s4283_s1 + $0x360] sm:$0xff]  }
 0x1f3   :  { %3030 = vmatprep.subr.bf16.mxu1 %v3436_v51 }
 0x1f4   :  { %3011 = vmatpush3.bf16.msra.mxu0 %v3313_v38  ;;  %v3365_v38 = vld [vmem:[%s4283_s1 + $0x328] sm:$0xff]  }
 0x1f5   :  { %3012 = vmatprep.subr.bf16.mxu0 %v3436_v51 }
 0x1f6   :  { %3031 = vmatpush3.bf16.msra.mxu1 %v3314_v39  ;;  %v3366_v39 = vld [vmem:[%s4283_s1 + $0x368] sm:$0xff]  }
 0x1f7   :  { %3032 = vmatprep.subr.bf16.mxu1 %v3436_v51 }
 0x1f8   :  { %3013 = vmatpush3.bf16.msra.mxu0 %v3315_v40  ;;  %v3367_v40 = vld [vmem:[%s4283_s1 + $0x330] sm:$0xff]  }
 0x1f9   :  { %3014 = vmatprep.subr.bf16.mxu0 %v3436_v51 }
 0x1fa   :  { %3033 = vmatpush3.bf16.msra.mxu1 %v3316_v41  ;;  %v3368_v41 = vld [vmem:[%s4283_s1 + $0x370] sm:$0xff]  }
 0x1fb   :  { %3034 = vmatprep.subr.bf16.mxu1 %v3436_v51 }
 0x1fc   :  { %3015 = vmatpush3.bf16.msra.mxu0 %v3317_v42  ;;  %v3369_v42 = vld [vmem:[%s4283_s1 + $0x338] sm:$0xff]  }
 0x1fd   :  { %3016 = vmatprep.subr.bf16.mxu0 %v3436_v51 }
 0x1fe   :  { %3035 = vmatpush3.bf16.msra.mxu1 %v3318_v43  ;;  %v3370_v43 = vld [vmem:[%s4283_s1 + $0x378] sm:$0xff]  }
 0x1ff   :  { %3036 = vmatprep.subr.bf16.mxu1 %v3436_v51 }
 0x200   :  { %3017 = vmatpush3.bf16.msra.mxu0 %v3319_v44  ;;  %v576_v44 = vcombine.high %v3684_v58, %v3436_v51 }
 0x201   :  { %3018 = vmatprep.subr.bf16.mxu0 %v3436_v51 }
 0x202   :  { %3037 = vmatpush3.bf16.msra.mxu1 %v3320_v45  ;;  %v3371_v45 = vld [vmem:[%s4283_s1 + $0x380] sm:$0xff]   ;;  %v591_v48 = vpack.c.bf16 %v576_v44, %v576_v44 }
 0x203   :  { %3038 = vmatprep.subr.bf16.mxu1 %v3436_v51 }
 0x204   :  { %3019 = vmatpush3.bf16.msra.mxu0 %v3321_v46  ;;  %v590_v46 = vpack.c.bf16 %v3684_v58, %v3684_v58  ;;  %v3374_v58 = vld [vmem:[%s4283_s1 + $0x3c8] sm:$0xff]  }
 0x205   :  { %3044 = vmatprep.subr.bf16.mxu0 %v3436_v51 }
 0x206   :  { %3039 = vmatpush3.bf16.msra.mxu1 %v3322_v47  ;;  %v3372_v47 = vld [vmem:[%s4283_s1 + $0x3c0] sm:$0xff]  }
 0x207   :  { %3021 = vmatmul.mubr.bf16.vlgmr.msra.gmra.mrb[20].mxu0 %v584_v54  ;;  %3064 = vmatprep.subr.bf16.mxu1 %v3436_v51  ;;  %v3375_v54 = vld [vmem:[%s4283_s1 + $0x390] sm:$0xff]  }
 0x208   :  { %3045 = vmatpush3.bf16.msra.mxu0 %v3323_v53  ;;  %3060 = vmatprep.mubr.msk.bf16.mxu0 %vm3437_vm2, %v3436_v51  ;;  %v3373_v53 = vld [vmem:[%s4283_s1 + $0x388] sm:$0xff]  }
 0x209   :  { %3041 = vmatmul.mubr.bf16.vlgmr.msra.gmra.mrb[20].mxu1 %v585_v56  ;;  %3046 = vmatprep.subr.bf16.mxu0 %v3436_v51  ;;  %v3377_v56 = vld [vmem:[%s4283_s1 + $0x398] sm:$0xff]  }
 0x20a   :  { %3065 = vmatpush3.bf16.msra.mxu1 %v3324_v55  ;;  %3080 = vmatprep.mubr.msk.bf16.mxu1 %vm3437_vm2, %v3436_v51  ;;  %v3376_v55 = vld [vmem:[%s4283_s1 + $0x3d0] sm:$0xff]  }
 0x20b   :  { %3066 = vmatprep.subr.bf16.mxu1 %v3436_v51 }
 0x20c   :  { %3047 = vmatpush3.bf16.msra.mxu0 %v3325_v57  ;;  %v3378_v57 = vld [vmem:[%s4283_s1 + $0x3d8] sm:$0xff]  }
 0x20d   :  { %3048 = vmatprep.subr.bf16.mxu0 %v3436_v51 }
 0x20e   :  { %3067 = vmatpush3.bf16.msra.mxu1 %v3326_v49  ;;  %v3379_v49 = vld [vmem:[%s4283_s1 + $0x3a0] sm:$0xff]  }
 0x20f   :  { %3068 = vmatprep.subr.bf16.mxu1 %v3436_v51 }
 0x210   :  { %3049 = vmatpush3.bf16.msra.mxu0 %v3327_v60  ;;  %v3380_v60 = vld [vmem:[%s4283_s1 + $0x3e0] sm:$0xff]  }
 0x211   :  { %3050 = vmatprep.subr.bf16.mxu0 %v3436_v51 }
 0x212   :  { %3069 = vmatpush3.bf16.msra.mxu1 %v3328_v61  ;;  %v3381_v61 = vld [vmem:[%s4283_s1 + $0x3a8] sm:$0xff]  }
 0x213   :  { %3070 = vmatprep.subr.bf16.mxu1 %v3436_v51 }
 0x214   :  { %3051 = vmatpush3.bf16.msra.mxu0 %v3329_v62 }
 0x215   :  { %3052 = vmatprep.subr.bf16.mxu0 %v3436_v51 }
 0x216   :  { %3071 = vmatpush3.bf16.msra.mxu1 %v3330_v63  ;;  %v3382_v63 = vld [vmem:[%s4283_s1 + $0x3e8] sm:$0xff]  }
 0x217   :  { %3072 = vmatprep.subr.bf16.mxu1 %v3436_v51 }
 0x218   :  { %3053 = vmatpush3.bf16.msra.mxu0 %v3331_v0 }
 0x219   :  { %3054 = vmatprep.subr.bf16.mxu0 %v3436_v51 }
 0x21a   :  { %3073 = vmatpush3.bf16.msra.mxu1 %v3332_v1 }
 0x21b   :  { %3074 = vmatprep.subr.bf16.mxu1 %v3436_v51 }
 0x21c   :  { %3055 = vmatpush3.bf16.msra.mxu0 %v3333_v2 }
 0x21d   :  { %3056 = vmatprep.subr.bf16.mxu0 %v3436_v51 }
 0x21e   :  { %3075 = vmatpush3.bf16.msra.mxu1 %v3334_v3  ;;  %v3383_v3 = vld [vmem:[%s4283_s1 + $0x3b0] sm:$0xff]  }
 0x21f   :  { %3076 = vmatprep.subr.bf16.mxu1 %v3436_v51 }
 0x220   :  { %3057 = vmatpush3.bf16.msra.mxu0 %v3335_v4 }
 0x221   :  { %3058 = vmatprep.subr.bf16.mxu0 %v3436_v51 }
 0x222   :  { %3077 = vmatpush3.bf16.msra.mxu1 %v3336_v5 }
 0x223   :  { %3078 = vmatprep.subr.bf16.mxu1 %v3436_v51 }
 0x224   :  { %3059 = vmatpush3.bf16.msra.mxu0 %v3337_v6 }
 0x225   :  { %3084 = vmatprep.subr.bf16.mxu0 %v3436_v51 }
 0x226   :  { %3079 = vmatpush3.bf16.msra.mxu1 %v3338_v7 }
 0x227   :  { %3061 = vmatmul.mubr.bf16.vlgmr.msra.gmra.mrb[24].mxu0 %v586_v10  ;;  %3104 = vmatprep.subr.bf16.mxu1 %v3436_v51  ;;  %v3384_v10 = vld [vmem:[%s4283_s1 + $0x3f0] sm:$0xff]  }
 0x228   :  { %3085 = vmatpush3.bf16.msra.mxu0 %v3339_v9  ;;  %3100 = vmatprep.mubr.msk.bf16.mxu0 %vm3437_vm2, %v3436_v51 }
 0x229   :  { %3081 = vmatmul.mubr.bf16.vlgmr.msra.gmra.mrb[24].mxu1 %v587_v12  ;;  %3086 = vmatprep.subr.bf16.mxu0 %v3436_v51  ;;  %v3385_v12 = vld [vmem:[%s4283_s1 + $0x3b8] sm:$0xff]  }
 0x22a   :  { %3105 = vmatpush3.bf16.msra.mxu1 %v3340_v11  ;;  %3120 = vmatprep.mubr.msk.bf16.mxu1 %vm3437_vm2, %v3436_v51 }
 0x22b   :  { %3106 = vmatprep.subr.bf16.mxu1 %v3436_v51 }
 0x22c   :  { %3087 = vmatpush3.bf16.msra.mxu0 %v3341_v13  ;;  %v3386_v13 = vld [vmem:[%s4283_s1 + $0x3f8] sm:$0xff]  }
 0x22d   :  { %3088 = vmatprep.subr.bf16.mxu0 %v3436_v51 }
 0x22e   :  { %3107 = vmatpush3.bf16.msra.mxu1 %v3342_v50  ;;  %v577_v50 = vcombine.high %v3687_v59, %v3436_v51 }
 0x22f   :  { %3108 = vmatprep.subr.bf16.mxu1 %v3436_v51 }
 0x230   :  { %3089 = vmatpush3.bf16.msra.mxu0 %v3343_v14  ;;  %v592_v14 = vpack.c.bf16 %v3687_v59, %v3687_v59 }
 0x231   :  { %3090 = vmatprep.subr.bf16.mxu0 %v3436_v51 }
 0x232   :  { %3109 = vmatpush3.bf16.msra.mxu1 %v3344_v15  ;;  %v593_v15 = vpack.c.bf16 %v577_v50, %v577_v50 }
 0x233   :  { %3110 = vmatprep.subr.bf16.mxu1 %v3436_v51 }
 0x234   :  { %3091 = vmatpush3.bf16.msra.mxu0 %v3345_v16 }
 0x235   :  { %3092 = vmatprep.subr.bf16.mxu0 %v3436_v51 }
 0x236   :  { %3111 = vmatpush3.bf16.msra.mxu1 %v3346_v17 }
 0x237   :  { %3112 = vmatprep.subr.bf16.mxu1 %v3436_v51 }
 0x238   :  { %3093 = vmatpush3.bf16.msra.mxu0 %v3347_v18 }
 0x239   :  { %3094 = vmatprep.subr.bf16.mxu0 %v3436_v51 }
 0x23a   :  { %3113 = vmatpush3.bf16.msra.mxu1 %v3348_v19 }
 0x23b   :  { %3114 = vmatprep.subr.bf16.mxu1 %v3436_v51 }
 0x23c   :  { %3095 = vmatpush3.bf16.msra.mxu0 %v3349_v20 }
 0x23d   :  { %3096 = vmatprep.subr.bf16.mxu0 %v3436_v51 }
 0x23e   :  { %3115 = vmatpush3.bf16.msra.mxu1 %v3350_v21 }
 0x23f   :  { %3116 = vmatprep.subr.bf16.mxu1 %v3436_v51 }
 0x240   :  { %3097 = vmatpush3.bf16.msra.mxu0 %v3351_v22 }
 0x241   :  { %3098 = vmatprep.subr.bf16.mxu0 %v3436_v51 }
 0x242   :  { %3117 = vmatpush3.bf16.msra.mxu1 %v3352_v23 }
 0x243   :  { %3118 = vmatprep.subr.bf16.mxu1 %v3436_v51 }
 0x244   :  { %3099 = vmatpush3.bf16.msra.mxu0 %v3353_v25 }
 0x245   :  { %3124 = vmatprep.subr.bf16.mxu0 %v3436_v51 }
 0x246   :  { %3119 = vmatpush3.bf16.msra.mxu1 %v3354_v26 }
 0x247   :  { %3101 = vmatmul.mubr.bf16.vlgmr.msra.gmra.mrb[28].mxu0 %v588_v24  ;;  %3144 = vmatprep.subr.bf16.mxu1 %v3436_v51 }
 0x248   :  { %3125 = vmatpush3.bf16.msra.mxu0 %v3355_v29  ;;  %3140 = vmatprep.mubr.msk.bf16.mxu0 %vm3437_vm2, %v3436_v51 }
 0x249   :  { %3121 = vmatmul.mubr.bf16.vlgmr.msra.gmra.mrb[28].mxu1 %v589_v30  ;;  %3126 = vmatprep.subr.bf16.mxu0 %v3436_v51 }
 0x24a   :  { %3145 = vmatpush3.bf16.msra.mxu1 %v3356_v27  ;;  %3160 = vmatprep.mubr.msk.bf16.mxu1 %vm3437_vm2, %v3436_v51 }
 0x24b   :  { %3146 = vmatprep.subr.bf16.mxu1 %v3436_v51 }
 0x24c   :  { %3127 = vmatpush3.bf16.msra.mxu0 %v3357_v32 }
 0x24d   :  { %3128 = vmatprep.subr.bf16.mxu0 %v3436_v51 }
 0x24e   :  { %3147 = vmatpush3.bf16.msra.mxu1 %v3358_v52 }
 0x24f   :  { %3148 = vmatprep.subr.bf16.mxu1 %v3436_v51 }
 0x250   :  { %3129 = vmatpush3.bf16.msra.mxu0 %v3359_v31 }
 0x251   :  { %3130 = vmatprep.subr.bf16.mxu0 %v3436_v51 }
 0x252   :  { %3149 = vmatpush3.bf16.msra.mxu1 %v3360_v33 }
 0x253   :  { %3150 = vmatprep.subr.bf16.mxu1 %v3436_v51 }
 0x254   :  { %3131 = vmatpush3.bf16.msra.mxu0 %v3361_v34 }
 0x255   :  { %3132 = vmatprep.subr.bf16.mxu0 %v3436_v51 }
 0x256   :  { %3151 = vmatpush3.bf16.msra.mxu1 %v3362_v35 }
 0x257   :  { %3152 = vmatprep.subr.bf16.mxu1 %v3436_v51 }
 0x258   :  { %3133 = vmatpush3.bf16.msra.mxu0 %v3363_v36 }
 0x259   :  { %3134 = vmatprep.subr.bf16.mxu0 %v3436_v51 }
 0x25a   :  { %3153 = vmatpush3.bf16.msra.mxu1 %v3364_v37 }
 0x25b   :  { %3154 = vmatprep.subr.bf16.mxu1 %v3436_v51 }
 0x25c   :  { %3135 = vmatpush3.bf16.msra.mxu0 %v3365_v38 }
 0x25d   :  { %3136 = vmatprep.subr.bf16.mxu0 %v3436_v51 }
 0x25e   :  { %3155 = vmatpush3.bf16.msra.mxu1 %v3366_v39 }
 0x25f   :  { %3156 = vmatprep.subr.bf16.mxu1 %v3436_v51 }
 0x260   :  { %3137 = vmatpush3.bf16.msra.mxu0 %v3367_v40 }
 0x261   :  { %3138 = vmatprep.subr.bf16.mxu0 %v3436_v51 }
 0x262   :  { %3157 = vmatpush3.bf16.msra.mxu1 %v3368_v41 }
 0x263   :  { %3158 = vmatprep.subr.bf16.mxu1 %v3436_v51 }
 0x264   :  { %3139 = vmatpush3.bf16.msra.mxu0 %v3369_v42 }
 0x265   :  { %3164 = vmatprep.subr.bf16.mxu0 %v3436_v51 }
 0x266   :  { %3159 = vmatpush3.bf16.msra.mxu1 %v3370_v43 }
 0x267   :  { %3141 = vmatmul.mubr.bf16.vlgmr.msra.gmra.mrb[32].mxu0 %v590_v46  ;;  %3184 = vmatprep.subr.bf16.mxu1 %v3436_v51 }
 0x268   :  { %3165 = vmatpush3.bf16.msra.mxu0 %v3371_v45  ;;  %3180 = vmatprep.mubr.msk.bf16.mxu0 %vm3437_vm2, %v3436_v51 }
 0x269   :  { %3161 = vmatmul.mubr.bf16.vlgmr.msra.gmra.mrb[32].mxu1 %v591_v48  ;;  %3166 = vmatprep.subr.bf16.mxu0 %v3436_v51 }
 0x26a   :  { %3185 = vmatpush3.bf16.msra.mxu1 %v3372_v47  ;;  %3200 = vmatprep.mubr.msk.bf16.mxu1 %vm3437_vm2, %v3436_v51 }
 0x26b   :  { %3186 = vmatprep.subr.bf16.mxu1 %v3436_v51 }
 0x26c   :  { %3167 = vmatpush3.bf16.msra.mxu0 %v3373_v53 }
 0x26d   :  { %3168 = vmatprep.subr.bf16.mxu0 %v3436_v51 }
 0x26e   :  { %3187 = vmatpush3.bf16.msra.mxu1 %v3374_v58  ;;  %v3387_v58 = vld [vmem:[%s4284_s2] sm:$0xff]  }
 0x26f   :  { %3188 = vmatprep.subr.bf16.mxu1 %v3436_v51 }
 0x270   :  { %3169 = vmatpush3.bf16.msra.mxu0 %v3375_v54 }
 0x271   :  { %3170 = vmatprep.subr.bf16.mxu0 %v3436_v51 }
 0x272   :  { %3189 = vmatpush3.bf16.msra.mxu1 %v3376_v55 }
 0x273   :  { %3190 = vmatprep.subr.bf16.mxu1 %v3436_v51 }
 0x274   :  { %3171 = vmatpush3.bf16.msra.mxu0 %v3377_v56 }
 0x275   :  { %3172 = vmatprep.subr.bf16.mxu0 %v3436_v51 }
 0x276   :  { %3191 = vmatpush3.bf16.msra.mxu1 %v3378_v57 }
 0x277   :  { %3192 = vmatprep.subr.bf16.mxu1 %v3436_v51 }
 0x278   :  { %3173 = vmatpush3.bf16.msra.mxu0 %v3379_v49 }
 0x279   :  { %3174 = vmatprep.subr.bf16.mxu0 %v3436_v51 }
 0x27a   :  { %3193 = vmatpush3.bf16.msra.mxu1 %v3380_v60  ;;  %v932_v62 = vpop.f32.mrb[8].mxu0 }
 0x27b   :  { %v2902_v0 = vpop.f32.mrb[9].mxu0  ;;  %3194 = vmatprep.subr.bf16.mxu1 %v3436_v51  ;;  %v2259_v4 = vsel %vm2258_vm3, %v932_v62, 0.0 }
 0x27c   :  { %3175 = vmatpush3.bf16.msra.mxu0 %v3381_v61  ;;  %v935_v1 = vpop.f32.mrb[10].mxu0  ;;  %v1020_v2 = vpop.f32.mrb[8].mxu1  ;;  %v3388_v0 = vld [vmem:[%s4284_s2 + $0x8] sm:$0xff]  }
 0x27d   :  { %v2260_v5 = vsel %vm2258_vm3, %v1020_v2, 0.0  ;;  %v2903_v6 = vpop.f32.mrb[11].mxu0  ;;  %v2922_v7 = vpop.f32.mrb[9].mxu1  ;;  %3176 = vmatprep.subr.bf16.mxu0 %v3436_v51 }
 0x27e   :  { %v2261_v8 = vadd.f32 %v2260_v5, %v2259_v4  ;;  %3195 = vmatpush3.bf16.msra.mxu1 %v3382_v63  ;;  %v1023_v9 = vpop.f32.mrb[10].mxu1  ;;  %v3389_v4 = vld [vmem:[%s4284_s2 + $0x10] sm:$0xff]   ;;  %v3390_v5 = vld [vmem:[%s4284_s2 + $0x18] sm:$0xff]   ;;  %v3391_v6 = vld [vmem:[%s4284_s2 + $0x20] sm:$0xff]  }
 0x27f   :  { %v2923_v11 = vpop.f32.mrb[11].mxu1  ;;  %3196 = vmatprep.subr.bf16.mxu1 %v3436_v51  ;;  %v3392_v7 = vld [vmem:[%s4284_s2 + $0x28] sm:$0xff]   ;;  %v3394_v9 = vld [vmem:[%s4284_s2 + $0x38] sm:$0xff]  }
 0x280   :  { %3177 = vmatpush3.bf16.msra.mxu0 %v3383_v3 }
 0x281   :  { %3178 = vmatprep.subr.bf16.mxu0 %v3436_v51 }
 0x282   :  { %3197 = vmatpush3.bf16.msra.mxu1 %v3384_v10 }
 0x283   :  { %3198 = vmatprep.subr.bf16.mxu1 %v3436_v51 }
 0x284   :  { %3179 = vmatpush3.bf16.msra.mxu0 %v3385_v12 }
 0x285   :  { %3204 = vmatprep.subr.bf16.mxu0 %v3436_v51 }
 0x286   :  { %3199 = vmatpush3.bf16.msra.mxu1 %v3386_v13 }
 0x287   :  { %3181 = vmatmul.mubr.bf16.vlgmr.msra.gmra.mrb[36].mxu0 %v592_v14  ;;  %3224 = vmatprep.subr.bf16.mxu1 %v3436_v51 }
 0x288   :  { %3220 = vmatprep.mubr.msk.bf16.mxu0 %vm3437_vm2, %v3436_v51  ;;  %3205 = vmatpush3.bf16.msra.mxu0 %v3387_v58 }
 0x289   :  { %3201 = vmatmul.mubr.bf16.vlgmr.msra.gmra.mrb[36].mxu1 %v593_v15  ;;  %3206 = vmatprep.subr.bf16.mxu0 %v3436_v51 }
 0x28a   :  { %3240 = vmatprep.mubr.msk.bf16.mxu1 %vm3437_vm2, %v3436_v51 }
 0x28c   :  { %3207 = vmatpush3.bf16.msra.mxu0 %v3388_v0 }
 0x28d   :  { %3208 = vmatprep.subr.bf16.mxu0 %v3436_v51 }
 0x290   :  { %3209 = vmatpush3.bf16.msra.mxu0 %v3389_v4 }
 0x291   :  { %3210 = vmatprep.subr.bf16.mxu0 %v3436_v51 }
 0x294   :  { %3211 = vmatpush3.bf16.msra.mxu0 %v3390_v5 }
 0x295   :  { %3212 = vmatprep.subr.bf16.mxu0 %v3436_v51 }
 0x298   :  { %3213 = vmatpush3.bf16.msra.mxu0 %v3391_v6 }
 0x299   :  { %3214 = vmatprep.subr.bf16.mxu0 %v3436_v51 }
 0x29a   :  { %v1108_v16 = vpop.f32.mrb[12].mxu0 }
 0x29b   :  { %v2262_v17 = vsel %vm2258_vm3, %v1108_v16, 0.0  ;;  %v2942_v18 = vpop.f32.mrb[13].mxu0 }
 0x29c   :  { %v2263_v19 = vadd.f32 %v2262_v17, %v2261_v8  ;;  %v1111_v59 = vpop.f32.mrb[14].mxu0  ;;  %v1196_v20 = vpop.f32.mrb[12].mxu1  ;;  %3215 = vmatpush3.bf16.msra.mxu0 %v3392_v7  ;;  %v3393_v8 = vld [vmem:[%s4284_s2 + $0x30] sm:$0xff]  }
 0x29d   :  { %v2264_v21 = vsel %vm2258_vm3, %v1196_v20, 0.0  ;;  %v2943_v22 = vpop.f32.mrb[15].mxu0  ;;  %v2962_v23 = vpop.f32.mrb[13].mxu1  ;;  %3216 = vmatprep.subr.bf16.mxu0 %v3436_v51 }
 0x29e   :  { %v2265_v25 = vadd.f32 %v2264_v21, %v2263_v19  ;;  %v1199_v26 = vpop.f32.mrb[14].mxu1 }
 0x29f   :  { %v2963_v28 = vpop.f32.mrb[15].mxu1 }
 0x2a0   :  { %3217 = vmatpush3.bf16.msra.mxu0 %v3393_v8  ;;  %v3395_v8 = vld [vmem:[%s4284_s2 + $0x40] sm:$0xff]  }
 0x2a1   :  { %3218 = vmatprep.subr.bf16.mxu0 %v3436_v51  ;;  %3225 = vmatpush3.bf16.msra.mxu1 %v3395_v8 }
 0x2a2   :  { %3226 = vmatprep.subr.bf16.mxu1 %v3436_v51 }
 0x2a4   :  { %3219 = vmatpush3.bf16.msra.mxu0 %v3394_v9  ;;  %v3396_v9 = vld [vmem:[%s4284_s2 + $0x48] sm:$0xff]  }
 0x2a5   :  { %3227 = vmatpush3.bf16.msra.mxu1 %v3396_v9 }
 0x2a6   :  { %3228 = vmatprep.subr.bf16.mxu1 %v3436_v51 }
 0x2ba   :  { %v1284_v29 = vpop.f32.mrb[16].mxu0 }
 0x2bb   :  { %v2266_v24 = vsel %vm2258_vm3, %v1284_v29, 0.0  ;;  %v2982_v27 = vpop.f32.mrb[17].mxu0 }
 0x2bc   :  { %v2267_v30 = vadd.f32 %v2266_v24, %v2265_v25  ;;  %v1287_v32 = vpop.f32.mrb[18].mxu0  ;;  %v1372_v52 = vpop.f32.mrb[16].mxu1 }
 0x2bd   :  { %v2268_v31 = vsel %vm2258_vm3, %v1372_v52, 0.0  ;;  %v2983_v33 = vpop.f32.mrb[19].mxu0  ;;  %v3002_v34 = vpop.f32.mrb[17].mxu1 }
 0x2be   :  { %v2269_v35 = vadd.f32 %v2268_v31, %v2267_v30  ;;  %v1375_v36 = vpop.f32.mrb[18].mxu1 }
 0x2bf   :  { %v3003_v37 = vpop.f32.mrb[19].mxu1 }
 0x2c0   :  { %v2703_v37 = vld [vmem:[%s4285_s3] ss:$0 sm:$0xff] }
 0x2da   :  { %v1460_v38 = vpop.f32.mrb[20].mxu0 }
 0x2db   :  { %v2270_v39 = vsel %vm2258_vm3, %v1460_v38, 0.0  ;;  %v3022_v40 = vpop.f32.mrb[21].mxu0 }
 0x2dc   :  { %v2271_v41 = vadd.f32 %v2270_v39, %v2269_v35  ;;  %v1463_v42 = vpop.f32.mrb[22].mxu0  ;;  %v1548_v43 = vpop.f32.mrb[20].mxu1 }
 0x2dd   :  { %v2272_v44 = vsel %vm2258_vm3, %v1548_v43, 0.0  ;;  %v3023_v45 = vpop.f32.mrb[23].mxu0  ;;  %v3042_v46 = vpop.f32.mrb[21].mxu1 }
 0x2de   :  { %v2273_v47 = vadd.f32 %v2272_v44, %v2271_v41  ;;  %v1551_v48 = vpop.f32.mrb[22].mxu1 }
 0x2df   :  { %v3043_v53 = vpop.f32.mrb[23].mxu1 }
 0x2fa   :  { %v1636_v54 = vpop.f32.mrb[24].mxu0 }
 0x2fb   :  { %v2274_v55 = vsel %vm2258_vm3, %v1636_v54, 0.0  ;;  %v3062_v56 = vpop.f32.mrb[25].mxu0 }
 0x2fc   :  { %v2275_v57 = vadd.f32 %v2274_v55, %v2273_v47  ;;  %v1639_v49 = vpop.f32.mrb[26].mxu0  ;;  %v1724_v60 = vpop.f32.mrb[24].mxu1 }
 0x2fd   :  { %v2276_v61 = vsel %vm2258_vm3, %v1724_v60, 0.0  ;;  %v3063_v62 = vpop.f32.mrb[27].mxu0  ;;  %v3082_v63 = vpop.f32.mrb[25].mxu1 }
 0x2fe   :  { %v2277_v1 = vadd.f32 %v2276_v61, %v2275_v57  ;;  %v1727_v2 = vpop.f32.mrb[26].mxu1 }
 0x2ff   :  { %v3083_v3 = vpop.f32.mrb[27].mxu1 }
 0x31a   :  { %v1812_v10 = vpop.f32.mrb[28].mxu0 }
 0x31b   :  { %v2278_v11 = vsel %vm2258_vm3, %v1812_v10, 0.0  ;;  %v3102_v12 = vpop.f32.mrb[29].mxu0  ;;  %v3397_v10 = vld [vmem:[%s4284_s2 + $0x50] sm:$0xff]  }
 0x31c   :  { %v2279_v13 = vadd.f32 %v2278_v11, %v2277_v1  ;;  %v1815_v50 = vpop.f32.mrb[30].mxu0  ;;  %v1900_v14 = vpop.f32.mrb[28].mxu1  ;;  %3229 = vmatpush3.bf16.msra.mxu1 %v3397_v10  ;;  %v3398_v11 = vld [vmem:[%s4284_s2 + $0x58] sm:$0xff]   ;;  %v3399_v12 = vld [vmem:[%s4284_s2 + $0x60] sm:$0xff]  }
 0x31d   :  { %v2280_v15 = vsel %vm2258_vm3, %v1900_v14, 0.0  ;;  %v3103_v16 = vpop.f32.mrb[31].mxu0  ;;  %v3122_v17 = vpop.f32.mrb[29].mxu1  ;;  %3230 = vmatprep.subr.bf16.mxu1 %v3436_v51  ;;  %v3401_v50 = vld [vmem:[%s4284_s2 + $0x70] sm:$0xff]   ;;  %v3402_v14 = vld [vmem:[%s4284_s2 + $0x78] sm:$0xff]  }
 0x31e   :  { %v2281_v18 = vadd.f32 %v2280_v15, %v2279_v13  ;;  %v1903_v19 = vpop.f32.mrb[30].mxu1  ;;  %v3400_v13 = vld [vmem:[%s4284_s2 + $0x68] sm:$0xff]   ;;  %v2704_v15 = vld [vmem:[%s4285_s3 + $0x1] ss:$0 sm:$0xff] }
 0x31f   :  { %v3123_v59 = vpop.f32.mrb[31].mxu1 }
 0x320   :  { %3231 = vmatpush3.bf16.msra.mxu1 %v3398_v11 }
 0x321   :  { %3232 = vmatprep.subr.bf16.mxu1 %v3436_v51 }
 0x324   :  { %3233 = vmatpush3.bf16.msra.mxu1 %v3399_v12 }
 0x325   :  { %3234 = vmatprep.subr.bf16.mxu1 %v3436_v51 }
 0x328   :  { %3235 = vmatpush3.bf16.msra.mxu1 %v3400_v13 }
 0x329   :  { %3236 = vmatprep.subr.bf16.mxu1 %v3436_v51 }
 0x32c   :  { %3237 = vmatpush3.bf16.msra.mxu1 %v3401_v50 }
 0x32d   :  { %3238 = vmatprep.subr.bf16.mxu1 %v3436_v51 }
 0x330   :  { %3239 = vmatpush3.bf16.msra.mxu1 %v3402_v14 }
 0x33a   :  { %v1988_v20 = vpop.f32.mrb[32].mxu0 }
 0x33b   :  { %v2282_v21 = vsel %vm2258_vm3, %v1988_v20, 0.0  ;;  %v3142_v22 = vpop.f32.mrb[33].mxu0 }
 0x33c   :  { %v2283_v23 = vadd.f32 %v2282_v21, %v2281_v18  ;;  %v1991_v25 = vpop.f32.mrb[34].mxu0  ;;  %v2076_v26 = vpop.f32.mrb[32].mxu1 }
 0x33d   :  { %v2284_v28 = vsel %vm2258_vm3, %v2076_v26, 0.0  ;;  %v3143_v29 = vpop.f32.mrb[35].mxu0  ;;  %v3162_v24 = vpop.f32.mrb[33].mxu1 }
 0x33e   :  { %v2285_v27 = vadd.f32 %v2284_v28, %v2283_v23  ;;  %v2079_v30 = vpop.f32.mrb[34].mxu1 }
 0x33f   :  { %v3163_v32 = vpop.f32.mrb[35].mxu1 }
 0x35a   :  { %v2164_v52 = vpop.f32.mrb[36].mxu0 }
 0x35b   :  { %v2286_v31 = vsel %vm2258_vm3, %v2164_v52, 0.0  ;;  %v3182_v33 = vpop.f32.mrb[37].mxu0 }
 0x35c   :  { %v2287_v34 = vadd.f32 %v2286_v31, %v2285_v27  ;;  %v2167_v35 = vpop.f32.mrb[38].mxu0  ;;  %v2252_v36 = vpop.f32.mrb[36].mxu1 }
 0x35d   :  { %v2288_v38 = vsel %vm2258_vm3, %v2252_v36, 0.0  ;;  %v3183_v39 = vpop.f32.mrb[39].mxu0  ;;  %v3202_v40 = vpop.f32.mrb[37].mxu1 }
 0x35e   :  { %v2289_v41 = vadd.f32 %v2288_v38, %v2287_v34  ;;  %v2255_v42 = vpop.f32.mrb[38].mxu1 }
 0x35f   :  { %v3203_v43 = vpop.f32.mrb[39].mxu1 }
 0x360   :  { %v2294_v44 = vadd.f32 %v2703_v37, %v2289_v41  ;;  %v2713_v41 = vld [vmem:[%s4285_s3 + $0x2] ss:$0 sm:$0xff] }
 0x362   :  { %v2295_v45 = vmax.f32 %v2294_v44, 0.0 }
 0x364   :  { %v2296_v46 = vsel %vm2258_vm3, %v2295_v45, 0.0 }
 0x365   :  { %v2297_v47 = vrot.slane %v2296_v46, 4 }
 0x367   :  { %v2298_v48 = vadd.f32 %v2297_v47, %v2296_v46 }
 0x369   :  { %v2299_v53 = vrot.slane %v2298_v48, 2 }
 0x36b   :  { %v2300_v58 = vadd.f32 %v2299_v53, %v2298_v48 }
 0x36d   :  { %v2301_v54 = vrot.slane %v2300_v58, 1 }
 0x36f   :  { %v2302_v55 = vadd.f32 %v2301_v54, %v2300_v58 }
 0x371   :  { %v2304_v56 = vmul.f32 0.5, %v2302_v55 }
 0x373   :  { %v2305_v57 = vsub.f32 %v2295_v45, %v2304_v56 }
 0x375   :  { %v2306_v49 = vmul.f32 %v2305_v57, %v2305_v57 }
 0x377   :  { %v2307_v60 = vsel %vm2258_vm3, %v2306_v49, 0.0 }
 0x378   :  { %v2308_v61 = vrot.slane %v2307_v60, 4 }
 0x37a   :  { %v2309_v62 = vadd.f32 %v2308_v61, %v2307_v60 }
 0x37c   :  { %v2310_v63 = vrot.slane %v2309_v62, 2 }
 0x37e   :  { %v2311_v0 = vadd.f32 %v2310_v63, %v2309_v62 }
 0x380   :  { %v2312_v1 = vrot.slane %v2311_v0, 1 }
 0x382   :  { %v2313_v2 = vadd.f32 %v2312_v1, %v2311_v0 }
 0x384   :  { %v2314_v3 = vmul.f32 0.5, %v2313_v2 }
 0x386   :  { %v2315_v4 = vadd.f32 1e-05, %v2314_v3 }
 0x388   :  { %3407 = vrsqrt.f32 %v2315_v4 }
 0x392   :  { %v3408_v5 = vpop.eup %3407 }
 0x393   :  { %v2317_v6 = vmul.f32 %v3408_v5, %v2305_v57 }
 0x395   :  { %v2318_v7 = vpack.c.bf16 %v2317_v6, %v2317_v6 }
 0x397   :  { %3221 = vmatmul.mubr.bf16.vlgmr.msra.gmra.mrb[40].mxu0 %v2318_v7 }
 0x46a   :  { %v2405_v16 = vpop.f32.mrb[40].mxu0 }
 0x46b   :  { %v2406_v17 = vadd.f32 %v2704_v15, %v2405_v16  ;;  %v3222_v18 = vpop.f32.mrb[41].mxu0 }
 0x46c   :  { %v2408_v19 = vpop.f32.mrb[42].mxu0 }
 0x46d   :  { %v2411_v59 = vmax.f32 %v2406_v17, 0.0  ;;  %v3223_v20 = vpop.f32.mrb[43].mxu0 }
 0x46f   :  { %v2412_v21 = vsel %vm2258_vm3, %v2411_v59, 0.0 }
 0x470   :  { %v2413_v22 = vrot.slane %v2412_v21, 4 }
 0x472   :  { %v2414_v23 = vadd.f32 %v2413_v22, %v2412_v21 }
 0x474   :  { %v2415_v51 = vrot.slane %v2414_v23, 2 }
 0x476   :  { %v2416_v25 = vadd.f32 %v2415_v51, %v2414_v23 }
 0x478   :  { %v2417_v26 = vrot.slane %v2416_v25, 1 }
 0x47a   :  { %v2418_v28 = vadd.f32 %v2417_v26, %v2416_v25 }
 0x47c   :  { %v2419_v29 = vmul.f32 0.5, %v2418_v28 }
 0x47e   :  { %v2420_v24 = vsub.f32 %v2411_v59, %v2419_v29 }
 0x480   :  { %v2421_v27 = vmul.f32 %v2420_v24, %v2420_v24 }
 0x482   :  { %v2422_v30 = vsel %vm2258_vm3, %v2421_v27, 0.0 }
 0x483   :  { %v2423_v32 = vrot.slane %v2422_v30, 4 }
 0x485   :  { %v2424_v52 = vadd.f32 %v2423_v32, %v2422_v30 }
 0x487   :  { %v2425_v31 = vrot.slane %v2424_v52, 2 }
 0x489   :  { %v2426_v33 = vadd.f32 %v2425_v31, %v2424_v52 }
 0x48b   :  { %v2427_v34 = vrot.slane %v2426_v33, 1 }
 0x48d   :  { %v2428_v35 = vadd.f32 %v2427_v34, %v2426_v33 }
 0x48f   :  { %v2429_v36 = vmul.f32 0.5, %v2428_v35 }
 0x491   :  { %v2430_v37 = vadd.f32 1e-05, %v2429_v36 }
 0x493   :  { %3409 = vrsqrt.f32 %v2430_v37 }
 0x49d   :  { %v3410_v38 = vpop.eup %3409 }
 0x49e   :  { %v2432_v39 = vmul.f32 %v3410_v38, %v2420_v24 }
 0x4a0   :  { %v2433_v40 = vpack.c.bf16 %v2432_v39, %v2432_v39 }
 0x4a2   :  { %3241 = vmatmul.mubr.bf16.vlgmr.msra.gmra.mrb[40].mxu1 %v2433_v40 }
 0x575   :  { %v2520_v42 = vpop.f32.mrb[40].mxu1 }
 0x576   :  { %v2521_v43 = vadd.f32 %v2713_v41, %v2520_v42  ;;  %v3242_v44 = vpop.f32.mrb[41].mxu1 }
 0x577   :  { %v2523_v45 = vpop.f32.mrb[42].mxu1 }
 0x578   :  { %v3243_v46 = vpop.f32.mrb[43].mxu1  ;;  %2527 = vst.msk [vmem:[#allocation2] sm:$0x3] %vm2526_vm4, %v2521_v43 }
 0x579   :  { %3422 = shalt.err (!%p3419_p4)
}
 0x57a   :  { %s3423_s3 = scalar_lea.hbm %s4286_s4, 32 }
 0x57b   :  { %p3424_p5 = scmp.ne.s32.totalorder %s4286_s4, %s3423_s3  ;;  %p3427_p6 = scmp.lt.u32.totalorder %s3423_s3, %s4286_s4 }
 0x57d   :  { %p3429_p7 = pnand %p3427_p6, %p3424_p5 }
 0x57f   :  { %3432 = shalt.err (!%p3429_p7)
}
 0x580   :  { %2537 = dma.vmem_to_hbm [thread:$0]  %s2535_s26, 32, %s4286_s4, [#allocation3]  }
 0x581   :  { %3433 = dma.done.wait [#allocation3], 32  }
 0x582   :  { %3434 = vsyncadd [#allocation3], 4294967264 }
 0x583   :  { %2541 = vsyncpa [#allocation3], 1 }

</bundles_post_ra>
